<compile_context>
chip_gen: v5e
topology: v5e:2x2
jax: 0.10.0
libtpu: 0.0.40
codegen_flags: <defaults>
</compile_context>

<pallas_src>
import functools

import numpy as np

import jax
import jax.numpy as jnp
from jax.experimental import pallas as pl
from jax.experimental.pallas import tpu as pltpu

INPUT_CH = 4
GEO_FEAT_DIM = 15
HIDDEN_DIM_COLOR = 64
NUM_LAYERS_COLOR = 3
IN_DIM = INPUT_CH + GEO_FEAT_DIM   # 19
OUT_DIM = 3

_CHUNK = 512   # in-kernel row sub-block; bounds intermediate live ranges
_LANE = 128    # VMEM lane width: 19- and 3-wide blocks lane-pad to this


def _round_up(x, m):
    return ((x + m - 1) // m) * m


def colornet_kernel(x_ref, w0_ref, w1_ref, w2_ref, o_ref, *, chunk):
    """Fused 3-layer MLP on one (tile_n, 19) row-tile, processed in row chunks.

    MXU operands are bf16 (weights arrive bf16; the x chunk is cast VMEM-side),
    accumulation is f32, ReLU runs on the f32 accumulator.
    """
    # Weights are tiny (~11 KB bf16) with constant index_maps: the pipeline
    # keeps the blocks resident across grid steps (no per-step re-DMA).  Hoist
    # the VMEM->vreg loads out of the chunk loop.
    w0 = w0_ref[...]
    w1 = w1_ref[...]
    w2 = w2_ref[...]

    n_chunks = x_ref.shape[0] // chunk  # static; tile_n is a multiple of chunk

    @pl.loop(0, n_chunks)
    def _(c):
        r = pl.multiple_of(c * chunk, chunk)
        x = x_ref[pl.ds(r, chunk), :].astype(jnp.bfloat16)            # (chunk, 19) bf16
        h = jnp.dot(x, w0, preferred_element_type=jnp.float32)        # (chunk, 64) f32
        h = jnp.maximum(h, 0.0).astype(jnp.bfloat16)
        h = jnp.dot(h, w1, preferred_element_type=jnp.float32)        # (chunk, 64) f32
        h = jnp.maximum(h, 0.0).astype(jnp.bfloat16)
        out = jnp.dot(h, w2, preferred_element_type=jnp.float32)      # (chunk, 3) f32
        o_ref[pl.ds(r, chunk), :] = out.astype(o_ref.dtype)


@functools.partial(jax.jit, static_argnames=("tile_n", "chunk", "out_dtype"))
def colornet_forward(x, w0, w1, w2, *, tile_n=8192, chunk=_CHUNK,
                     out_dtype=jnp.float32):
    """x: (N, 19) f32 or bf16; weights: (19,64), (64,64), (64,3). Returns (N, 3)."""
    N, in_dim = x.shape
    assert in_dim == IN_DIM, in_dim

    # --- Tile sizing --------------------------------------------------------
    #  * multiple of `chunk` (exact in-kernel loop) and hence of 8 (sublanes)
    #  * clamped so grid_n >= 2 whenever N > chunk (v7x megacore: both TCs busy)
    #  * NO wrapper-side padding: Pallas handles the ragged last block.
    # On v5e/v6e (128 MiB VMEM) tile_n=16384 is also a good choice.
    tile_n = max(chunk, _round_up(min(tile_n, pl.cdiv(N, 2)), chunk))
    grid_n = pl.cdiv(N, tile_n)

    # --- VMEM budget (lane-padded blocks, double-buffered) -------------------
    x_blk = tile_n * _LANE * x.dtype.itemsize                 # (tile_n,19) pads to 128 lanes
    o_blk = tile_n * _LANE * np.dtype(out_dtype).itemsize     # (tile_n,3)  pads to 128 lanes
    vmem_limit = min(48 * 1024 * 1024,                        # well under v7x's 64 MiB/TC
                     2 * (x_blk + o_blk) + 16 * 1024 * 1024)  # 2x = double buffering + slack

    # bf16 MXU operands; accumulation stays f32 in-kernel.
    w0b = w0.astype(jnp.bfloat16)
    w1b = w1.astype(jnp.bfloat16)
    w2b = w2.astype(jnp.bfloat16)

    layer_weights = (IN_DIM * HIDDEN_DIM_COLOR
                     + HIDDEN_DIM_COLOR * HIDDEN_DIM_COLOR
                     + HIDDEN_DIM_COLOR * OUT_DIM)
    flops = 2 * N * layer_weights
    bytes_accessed = (N * IN_DIM * x.dtype.itemsize
                      + N * OUT_DIM * np.dtype(out_dtype).itemsize
                      + 2 * layer_weights)                    # bf16 weights

    return pl.pallas_call(
        functools.partial(colornet_kernel, chunk=chunk),
        out_shape=jax.ShapeDtypeStruct((N, OUT_DIM), out_dtype),
        grid_spec=pl.GridSpec(
            grid=(grid_n,),
            in_specs=[
                pl.BlockSpec((tile_n, IN_DIM), lambda i: (i, 0)),                      # x (streamed)
                pl.BlockSpec((IN_DIM, HIDDEN_DIM_COLOR), lambda i: (0, 0)),            # W0 (resident)
                pl.BlockSpec((HIDDEN_DIM_COLOR, HIDDEN_DIM_COLOR), lambda i: (0, 0)),  # W1 (resident)
                pl.BlockSpec((HIDDEN_DIM_COLOR, OUT_DIM), lambda i: (0, 0)),           # W2 (resident)
            ],
            out_specs=pl.BlockSpec((tile_n, OUT_DIM), lambda i: (i, 0)),
        ),
        compiler_params=pltpu.CompilerParams(
            dimension_semantics=("parallel",),
            vmem_limit_bytes=vmem_limit,
        ),
        cost_estimate=pl.CostEstimate(
            flops=flops, transcendentals=0, bytes_accessed=bytes_accessed),
    )(x, w0b, w1b, w2b)


def init_params(key):
    """Deterministic init mimicking nn.Linear (bias=False) kaiming-uniform bounds.

    PyTorch stores Linear weights as (out, in); we store the transpose (in, out)
    so the kernel computes x @ W directly.
    """
    k0, k1, k2 = jax.random.split(key, 3)

    def linear_w(k, in_dim, out_dim):
        bound = 1.0 / jnp.sqrt(jnp.float32(in_dim))
        return jax.random.uniform(
            k, (in_dim, out_dim), dtype=jnp.float32, minval=-bound, maxval=bound)

    w0 = linear_w(k0, IN_DIM, HIDDEN_DIM_COLOR)            # layer 0: 19 -> 64
    w1 = linear_w(k1, HIDDEN_DIM_COLOR, HIDDEN_DIM_COLOR)  # layer 1: 64 -> 64
    w2 = linear_w(k2, HIDDEN_DIM_COLOR, OUT_DIM)           # layer 2: 64 -> 3
    return w0, w1, w2


def colornet_reference_f32(x, w0, w1, w2):
    h = jnp.maximum(x.astype(jnp.float32) @ w0, 0.0)
    h = jnp.maximum(h @ w1, 0.0)
    return h @ w2


def colornet_reference_bf16(x, w0, w1, w2):
    """Same bf16-operand / f32-accumulate recipe as the kernel."""
    def dot(a, w):
        return jnp.dot(a.astype(jnp.bfloat16), w.astype(jnp.bfloat16),
                       preferred_element_type=jnp.float32)
    h = jnp.maximum(dot(x, w0), 0.0)
    h = jnp.maximum(dot(h, w1), 0.0)
    return dot(h, w2)


if __name__ == "__main__":
    key = jax.random.PRNGKey(0)
    k_in, k_params = jax.random.split(key)
    w0, w1, w2 = init_params(k_params)

    # Small shapes; N deliberately NOT a multiple of chunk/tile so the ragged
    # last-block path (no wrapper pad) and the grid_n>=2 clamp are exercised.
    x = None
    for n_rows in (1000, 2500):
        kx = jax.random.fold_in(k_in, n_rows)
        x = jax.random.normal(kx, (n_rows, IN_DIM), dtype=jnp.float32)

        out = jax.block_until_ready(colornet_forward(x, w0, w1, w2))
        assert out.shape == (n_rows, OUT_DIM), out.shape
        assert out.dtype == jnp.float32

        ref_bf16 = colornet_reference_bf16(x, w0, w1, w2)
        ref_f32 = colornet_reference_f32(x, w0, w1, w2)
        # Exact-recipe reference (bf16 operands, f32 accumulation).
        assert jnp.allclose(out, ref_bf16, atol=2e-3, rtol=2e-3), "mismatch vs bf16 reference"
        # Loose check vs full-f32 PyTorch-equivalent math (bf16 operand rounding).
        assert jnp.allclose(out, ref_f32, atol=5e-2, rtol=5e-2), "mismatch vs f32 reference"

    # Optional fast path: upstream feature producer hands us bf16 directly
    # (halves x HBM traffic and the x VMEM block); no wrapper-side cast.
    xb = x.astype(jnp.bfloat16)
    out_b = jax.block_until_ready(colornet_forward(xb, w0, w1, w2))
    assert jnp.allclose(out_b, colornet_reference_bf16(xb, w0, w1, w2),
                        atol=2e-3, rtol=2e-3), "mismatch on bf16-input path"

    print("KERNEL_OK")
</pallas_src>

<mosaic_0001>
module attributes {stable_mosaic.version = 11 : i64} {
  func.func @colornet_kernel(%arg0: i32, %arg1: memref<512x19xf32, #tpu.memory_space<vmem>>, %arg2: memref<19x64xbf16, #tpu.memory_space<vmem>>, %arg3: memref<64x64xbf16, #tpu.memory_space<vmem>>, %arg4: memref<64x3xbf16, #tpu.memory_space<vmem>>, %arg5: memref<512x3xf32, #tpu.memory_space<vmem>>) attributes {dimension_semantics = [#tpu.dimension_semantics<parallel>], iteration_bounds = array<i64: 2>, scalar_prefetch = 0 : i64, scratch_operands = 0 : i64, tpu.core_type = #tpu.core_type<tc>, window_params = [{transform_indices = @transform_0, window_bounds = array<i64: 512, 19>}, {pipeline_mode = #tpu.pipeline_mode<synchronous>, transform_indices = @transform_1, window_bounds = array<i64: 19, 64>}, {pipeline_mode = #tpu.pipeline_mode<synchronous>, transform_indices = @transform_2, window_bounds = array<i64: 64, 64>}, {pipeline_mode = #tpu.pipeline_mode<synchronous>, transform_indices = @transform_3, window_bounds = array<i64: 64, 3>}, {transform_indices = @transform_4, window_bounds = array<i64: 512, 3>}]} {
    %c0 = arith.constant 0 : index
    %c0_0 = arith.constant 0 : index
    %0 = vector.load %arg2[%c0, %c0_0] : memref<19x64xbf16, #tpu.memory_space<vmem>>, vector<19x64xbf16>
    %c0_1 = arith.constant 0 : index
    %c0_2 = arith.constant 0 : index
    %1 = vector.load %arg3[%c0_1, %c0_2] : memref<64x64xbf16, #tpu.memory_space<vmem>>, vector<64x64xbf16>
    %c0_3 = arith.constant 0 : index
    %c0_4 = arith.constant 0 : index
    %2 = vector.load %arg4[%c0_3, %c0_4] : memref<64x3xbf16, #tpu.memory_space<vmem>>, vector<64x3xbf16>
    %c0_i32 = arith.constant 0 : i32
    %c1_i32 = arith.constant 1 : i32
    %3 = arith.muli %c0_i32, %c1_i32 : i32
    %c0_i32_5 = arith.constant 0 : i32
    %4 = arith.addi %c0_i32_5, %3 : i32
    %c512_i32 = arith.constant 512 : i32
    %5 = arith.muli %4, %c512_i32 : i32
    %6 = tpu.assume_multiple %5, 512 : i32
    %7 = arith.index_cast %6 : i32 to index
    %c0_6 = arith.constant 0 : index
    %8 = vector.load %arg1[%7, %c0_6] : memref<512x19xf32, #tpu.memory_space<vmem>>, vector<512x19xf32>
    %9 = arith.truncf %8 : vector<512x19xf32> to vector<512x19xbf16>
    %cst = arith.constant dense<0.000000e+00> : vector<512x64xf32>
    %10 = tpu.matmul %9, %0, %cst {dimension_numbers = #tpu.dot_dimension_numbers<[1], [0], [0], [1], [0, 0, 1, 1], [], []>} : vector<512x19xbf16>, vector<19x64xbf16>, vector<512x64xf32> -> vector<512x64xf32>
    %cst_7 = arith.constant 0.000000e+00 : f32
    %11 = vector.broadcast %cst_7 : f32 to vector<512x64xf32>
    %12 = arith.maximumf %10, %11 : vector<512x64xf32>
    %13 = arith.truncf %12 : vector<512x64xf32> to vector<512x64xbf16>
    %cst_8 = arith.constant dense<0.000000e+00> : vector<512x64xf32>
    %14 = tpu.matmul %13, %1, %cst_8 {dimension_numbers = #tpu.dot_dimension_numbers<[1], [0], [0], [1], [0, 0, 1, 1], [], []>} : vector<512x64xbf16>, vector<64x64xbf16>, vector<512x64xf32> -> vector<512x64xf32>
    %cst_9 = arith.constant 0.000000e+00 : f32
    %15 = vector.broadcast %cst_9 : f32 to vector<512x64xf32>
    %16 = arith.maximumf %14, %15 : vector<512x64xf32>
    %17 = arith.truncf %16 : vector<512x64xf32> to vector<512x64xbf16>
    %cst_10 = arith.constant dense<0.000000e+00> : vector<512x3xf32>
    %18 = tpu.matmul %17, %2, %cst_10 {dimension_numbers = #tpu.dot_dimension_numbers<[1], [0], [0], [1], [0, 0, 1, 1], [], []>} : vector<512x64xbf16>, vector<64x3xbf16>, vector<512x3xf32> -> vector<512x3xf32>
    %19 = arith.index_cast %6 : i32 to index
    %c0_11 = arith.constant 0 : index
    %20 = vector.load %arg5[%19, %c0_11] : memref<512x3xf32, #tpu.memory_space<vmem>>, vector<512x3xf32>
    tpu.vector_store %arg5[%19, %c0_11], %18 {strides = array<i32>} : memref<512x3xf32, #tpu.memory_space<vmem>>, vector<512x3xf32>,
    %c1_i32_12 = arith.constant 1 : i32
    return
  }
  func.func @transform_0(%arg0: i32) -> (i32, i32) {
    %c0_i32 = arith.constant 0 : i32
    %c0_i32_0 = arith.constant 0 : i32
    return %arg0, %c0_i32 : i32, i32
  }
  func.func @transform_1(%arg0: i32) -> (i32, i32) {
    %c0_i32 = arith.constant 0 : i32
    %c0_i32_0 = arith.constant 0 : i32
    %c0_i32_1 = arith.constant 0 : i32
    return %c0_i32, %c0_i32_0 : i32, i32
  }
  func.func @transform_2(%arg0: i32) -> (i32, i32) {
    %c0_i32 = arith.constant 0 : i32
    %c0_i32_0 = arith.constant 0 : i32
    %c0_i32_1 = arith.constant 0 : i32
    return %c0_i32, %c0_i32_0 : i32, i32
  }
  func.func @transform_3(%arg0: i32) -> (i32, i32) {
    %c0_i32 = arith.constant 0 : i32
    %c0_i32_0 = arith.constant 0 : i32
    %c0_i32_1 = arith.constant 0 : i32
    return %c0_i32, %c0_i32_0 : i32, i32
  }
  func.func @transform_4(%arg0: i32) -> (i32, i32) {
    %c0_i32 = arith.constant 0 : i32
    %c0_i32_0 = arith.constant 0 : i32
    return %arg0, %c0_i32 : i32, i32
  }
}

</mosaic_0001>

<bundles_post_ra>
// kernel: colornet_forward.1
= control target key start
LH: loop header
LB: loop body
LE: loop exit
PB: predicated region body
PF: predicated region fallthrough
CT: control target
= control target key end

     0   :  { %s2174_s15 = smov 0   ;;  %s2176_s16 = smov 0   ;;  %s2692_s0 = inlined_call_operand.vmem [shape: f32[1000,19], index: 0, kind: input, shape index: {}]   ;;  %s2693_s1 = inlined_call_operand.vmem [shape: bf16[19,64], index: 1, kind: input, shape index: {}]   ;;  %s2694_s2 = inlined_call_operand.vmem [shape: bf16[64,64], index: 2, kind: input, shape index: {}]   ;;  %s2695_s3 = inlined_call_operand.vmem [shape: bf16[64,3], index: 3, kind: input, shape index: {}]   ;;  %s2696_s4 = inlined_call_operand.vmem [shape: f32[1000,3], index: 4, kind: output, shape index: {}]  }
   0x1   :  { %s2178_s17 = smov 0  }
   0x2 LB: > { %s2187_s18 = sadd.s32 4294967295, %s2114_s17   ;;  %s2189_s19 = sadd.s32 1, %s2114_s17   ;;  %s2114_s17 = sphi %s2178_s17, %s2705_s17   ;;  %s2110_s16 = sphi %s2176_s16, %s2704_s16   ;;  %s2106_s15 = sphi %s2174_s15, %s2703_s15  }
   0x3   : > { %s107_s20 = ssub.s32 %s2114_s17, %s2189_s19  ;;  %s110_s21 = sadd.s32 1, %s2110_s16 }
   0x4   : > { %p108_p0 = scmp.eq.s32.totalorder %s107_s20, 0  ;;  %p120_p1 = scmp.ne.s32.totalorder %s2110_s16, %s2106_s15 }
   0x5   : > { %p121_p2 = scmp.eq.s32.totalorder %s2187_s18, 1  ;;  %p1796_p3 = scmp.ge.s32.totalorder %s2114_s17, 1 }
   0x6   : > { %s2197_s22 = scalar_select %p108_p0, %s2110_s16, %s110_s21  }
   0x7   : > { %p2199_p4 = por %p121_p2, %p120_p1  ;;  %p171_p5 = scmp.lt.s32.totalorder %s2114_s17, 3 }
   0x9   : > { %p172_p6 = pnand %p1796_p3, %p171_p5 }
   0xa   : > { %s2207_s26 = sshll.u32 (!%p172_p6), %s2187_s18, 6  ;;  %s197_s5 = sand.u32 (!%p172_p6), 1, %s2106_s15  }
   0xb   : > { %175 = sbr.rel (%p172_p6) target bundleno = 1013 (0x3f5), region = 36  ;;  %p205_p7 = scmp.lt.s32.totalorder (!%p172_p6), %s2207_s26, 124 }
   0xc   : > { %s1797_s6 = sshll.u32 (!%p172_p6), %s197_s5, 9 }
   0xd   : > { %s2373_s15 = scalar_lea.vmem (!%p172_p6), [#allocation2], %s1797_s6  }
  0x10   : > { %v222_v0 = vld [vmem:[%s2693_s1 + $0x8] sm:$0x3]  ;;  %vm441_vm0 = vcmask 1040384   ;;  %vm442_vm1 = vcmask 1041408   ;;  %v2148_v2 = vmov 65535   ;;  %s206_s27 = scalar_select %p205_p7, %s2207_s26, 124 }
  0x11   : > { %v340_v1 = vunpack.c.l.b16 %v222_v0  ;;  %v443_v3 = vsel %vm441_vm0, 4294967295, %v2148_v2  ;;  %v1949_v7 = vld [vmem:[%s2693_s1] sm:$0xff]  ;;  %vm344_vm2 = vcmask 154624   ;;  %v1953_v26 = vld [vmem:[%s2694_s2 + $0x18] sm:$0xff]  ;;  %v1952_v30 = vld [vmem:[%s2694_s2 + $0x10] sm:$0xff]  ;;  %vm737_vm3 = vcmask 523264  }
  0x12   : > { %v444_v4 = vsel %vm442_vm1, %v443_v3, 0  ;;  %s1799_s28 = sshll.u32 %s206_s27, 3  ;;  %838 = vmatpush.bf16.msra.mxu1 %v1953_v26  ;;  %v1951_v31 = vld [vmem:[%s2694_s2 + $0x8] sm:$0xff]  ;;  %v1950_v32 = vld [vmem:[%s2694_s2] sm:$0xff]  ;;  %vm1388_vm4 = vcmask 23552   ;;  %s1958_s8 = sshll.u32 (%p2199_p4), %s2187_s18, 9 }
  0x13   : > { %v342_v5 = vpack.c.b16 %v340_v1, %v340_v1  ;;  %s2217_s7 = scalar_lea.vmem %s2692_s0, %s1799_s28  ;;  %s2557_s11 = scalar_lea.vmem (%p2199_p4), %s2696_s4, %s1958_s8  }
  0x14   : > { %v239_v8 = vld [vmem:[%s2217_s7] sm:$0xff]  ;;  %v240_v9 = vld [vmem:[%s2217_s7 + $0x8] sm:$0xff]  ;;  %v241_v11 = vld [vmem:[%s2217_s7 + $0x10] sm:$0xff] }
  0x15   : > { %v446_v6 = vand.u32 %v444_v4, %v342_v5  ;;  %v303_v10 = vpack.c.bf16 %v240_v9, %v239_v8  ;;  %v242_v12 = vld [vmem:[%s2217_s7 + $0x18] sm:$0xff]  ;;  %v243_v14 = vld [vmem:[%s2217_s7 + $0x20] sm:$0xff]  ;;  %v244_v15 = vld [vmem:[%s2217_s7 + $0x28] sm:$0xff] }
  0x16   : > { %v304_v13 = vpack.c.bf16 %v242_v12, %v241_v11  ;;  %v305_v16 = vpack.c.bf16 %v244_v15, %v243_v14  ;;  %v245_v17 = vld [vmem:[%s2217_s7 + $0x30] sm:$0xff]  ;;  %v246_v18 = vld [vmem:[%s2217_s7 + $0x38] sm:$0xff]  ;;  %v247_v20 = vld [vmem:[%s2217_s7 + $0x40] sm:$0xff]  ;;  %839 = vmatpush.bf16.msra.mxu1 %v1952_v30 }
  0x17   : > { %454 = vmatpush.bf16.msra.mxu0 %v446_v6  ;;  %1961 = vmatpush.bf16.msra.mxu3 %v446_v6  ;;  %v306_v19 = vpack.c.bf16 %v246_v18, %v245_v17  ;;  %v248_v21 = vld [vmem:[%s2217_s7 + $0x48] sm:$0xff]  ;;  %v249_v23 = vld [vmem:[%s2217_s7 + $0x50] sm:$0xff]  ;;  %v250_v24 = vld [vmem:[%s2217_s7 + $0x58] sm:$0xff] }
  0x18   : > { %v307_v22 = vpack.c.bf16 %v248_v21, %v247_v20  ;;  %v308_v25 = vpack.c.bf16 %v250_v24, %v249_v23  ;;  %v251_v27 = vld [vmem:[%s2217_s7 + $0x60] sm:$0xff]  ;;  %v252_v28 = vld [vmem:[%s2217_s7 + $0x68] sm:$0xff]  ;;  %v253_v33 = vld [vmem:[%s2217_s7 + $0x70] sm:$0xff] }
  0x19   : > { %v309_v29 = vpack.c.bf16 %v252_v28, %v251_v27  ;;  %v254_v34 = vld [vmem:[%s2217_s7 + $0x78] sm:$0xff]  ;;  %v255_v36 = vld [vmem:[%s2217_s7 + $0x80] sm:$0xff]  ;;  %v256_v37 = vld [vmem:[%s2217_s7 + $0x88] sm:$0xff] }
  0x1a   : > { %840 = vmatpush.bf16.msra.mxu1 %v1951_v31  ;;  %v310_v35 = vpack.c.bf16 %v254_v34, %v253_v33  ;;  %v311_v38 = vpack.c.bf16 %v256_v37, %v255_v36  ;;  %v257_v44 = vld [vmem:[%s2217_s7 + $0x90] sm:$0xff]  ;;  %v258_v45 = vld [vmem:[%s2217_s7 + $0x98] sm:$0xff]  ;;  %v259_v52 = vld [vmem:[%s2217_s7 + $0xa0] sm:$0xff] }
  0x1b   : > { %455 = vmatpush.bf16.msra.mxu0 %v1949_v7  ;;  %1962 = vmatpush.bf16.msra.mxu3 %v1949_v7  ;;  %v312_v46 = vpack.c.bf16 %v258_v45, %v257_v44  ;;  %v260_v53 = vld [vmem:[%s2217_s7 + $0xa8] sm:$0xff]  ;;  %v261_v60 = vld [vmem:[%s2217_s7 + $0xb0] sm:$0xff]  ;;  %v262_v61 = vld [vmem:[%s2217_s7 + $0xb8] sm:$0xff] }
  0x1c   : > { %v313_v54 = vpack.c.bf16 %v260_v53, %v259_v52  ;;  %v314_v62 = vpack.c.bf16 %v262_v61, %v261_v60  ;;  %v263_v4 = vld [vmem:[%s2217_s7 + $0xc0] sm:$0xff]  ;;  %v264_v5 = vld [vmem:[%s2217_s7 + $0xc8] sm:$0xff]  ;;  %v265_v12 = vld [vmem:[%s2217_s7 + $0xd0] sm:$0xff] }
  0x1d   : > { %v315_v6 = vpack.c.bf16 %v264_v5, %v263_v4  ;;  %v267_v20 = vld [vmem:[%s2217_s7 + $0xe0] sm:$0xff]  ;;  %v268_v21 = vld [vmem:[%s2217_s7 + $0xe8] sm:$0xff]  ;;  %v2285_v24 = vld [vmem:[%s2695_s3 + $0x18] sm:$0xff] }
  0x1e   : > { %1804 = vmatmul.msk.bf16.vlgmr.msra.gmra.mxu0 %vm344_vm2, %v303_v10  ;;  %841 = vmatpush.bf16.msra.mxu1 %v1950_v32  ;;  %v2291_v28 = vld [vmem:[%s2695_s3 + $0x10] sm:$0xff] }
  0x1f   : > { %1963 = vmatpush.bf16.msrb.mxu3 %v1953_v26  ;;  %1223 = vmatpush.bf16.msra.mxu2 %v2285_v24 }
  0x23   : > { %1964 = vmatpush.bf16.msrb.mxu3 %v1952_v30  ;;  %v269_v30 = vld [vmem:[%s2217_s7 + $0xf0] sm:$0xff]  ;;  %1224 = vmatpush.bf16.msra.mxu2 %v2291_v28 }
  0x27   : > { %1965 = vmatpush.bf16.msrb.mxu3 %v1951_v31  ;;  %v270_v31 = vld [vmem:[%s2217_s7 + $0xf8] sm:$0xff] }
  0x28   : > { %v318_v33 = vpack.c.bf16 %v270_v31, %v269_v30 }
  0x2b   : > { %1966 = vmatpush.bf16.msrb.mxu3 %v1950_v32  ;;  %v2300_v32 = vld [vmem:[%s2695_s3 + $0x8] sm:$0xff] }
  0x2c   : > { %1225 = vmatpush.bf16.msra.mxu2 %v2300_v32 }
  0x2e   : > { %1805 = vmatmul.msk.bf16.gmra.mxu0 %vm344_vm2, %v304_v13  ;;  %v266_v13 = vld [vmem:[%s2217_s7 + $0xd8] sm:$0xff] }
  0x2f   : > { %v316_v14 = vpack.c.bf16 %v266_v13, %v265_v12  ;;  %v278_v12 = vld [vmem:[%s2217_s7 + $0x138] sm:$0xff] }
  0x3e   : > { %1806 = vmatmul.msk.bf16.gmra.mxu0 %vm344_vm2, %v305_v16 }
  0x4e   : > { %1807 = vmatmul.msk.bf16.gmra.mxu0 %vm344_vm2, %v306_v19 }
  0x5e   : > { %1808 = vmatmul.msk.bf16.gmra.mxu0 %vm344_vm2, %v307_v22  ;;  %v317_v22 = vpack.c.bf16 %v268_v21, %v267_v20 }
  0x6e   : > { %1809 = vmatmul.msk.bf16.gmra.mxu0 %vm344_vm2, %v308_v25 }
  0x7e   : > { %1810 = vmatmul.msk.bf16.gmra.mxu0 %vm344_vm2, %v309_v29 }
  0x8e   : > { %1811 = vmatmul.msk.bf16.gmra.mxu0 %vm344_vm2, %v310_v35  ;;  %v2306_v35 = vld [vmem:[%s2695_s3] sm:$0xff] }
  0x8f   : > { %1226 = vmatpush.bf16.msra.mxu2 %v2306_v35 }
  0x9b   : > { %v457_v39 = vpop.f32.mrf.mxu0 }
  0x9c   : > { %v617_v41 = vmax.f32 %v457_v39, 0.0 }
  0x9e   : > { %1812 = vmatmul.msk.bf16.gmra.mxu0 %vm344_vm2, %v311_v38 }
  0xa3   : > { %v459_v40 = vpop.f32.mrf.mxu0 }
  0xa4   : > { %v618_v42 = vmax.f32 %v459_v40, 0.0  ;;  %v271_v40 = vld [vmem:[%s2217_s7 + $0x100] sm:$0xff] }
  0xa6   : > { %v681_v43 = vpack.c.bf16 %v618_v42, %v617_v41  ;;  %v272_v41 = vld [vmem:[%s2217_s7 + $0x108] sm:$0xff] }
  0xa7   : > { %v319_v42 = vpack.c.bf16 %v272_v41, %v271_v40  ;;  %v281_v41 = vld [vmem:[%s2217_s7 + $0x150] sm:$0xff] }
  0xa8   : > { %1852 = vmatmul.msk.bf16.vlgmr.msra.gmra.mxu1 %vm737_vm3, %v681_v43 }
  0xab   : > { %v462_v47 = vpop.f32.mrf.mxu0 }
  0xac   : > { %v619_v49 = vmax.f32 %v462_v47, 0.0 }
  0xae   : > { %1813 = vmatmul.msk.bf16.gmra.mxu0 %vm344_vm2, %v312_v46 }
  0xb3   : > { %v464_v48 = vpop.f32.mrf.mxu0 }
  0xb4   : > { %v620_v50 = vmax.f32 %v464_v48, 0.0 }
  0xb6   : > { %v682_v51 = vpack.c.bf16 %v620_v50, %v619_v49  ;;  %v273_v49 = vld [vmem:[%s2217_s7 + $0x110] sm:$0xff]  ;;  %v274_v50 = vld [vmem:[%s2217_s7 + $0x118] sm:$0xff] }
  0xb8   : > { %1853 = vmatmul.msk.bf16.gmra.mxu1 %vm737_vm3, %v682_v51  ;;  %v320_v51 = vpack.c.bf16 %v274_v50, %v273_v49 }
  0xbb   : > { %v467_v55 = vpop.f32.mrf.mxu0 }
  0xbc   : > { %v621_v57 = vmax.f32 %v467_v55, 0.0 }
  0xbe   : > { %1814 = vmatmul.msk.bf16.gmra.mxu0 %vm344_vm2, %v313_v54 }
  0xc3   : > { %v469_v56 = vpop.f32.mrf.mxu0 }
  0xc4   : > { %v622_v58 = vmax.f32 %v469_v56, 0.0 }
  0xc6   : > { %v683_v59 = vpack.c.bf16 %v622_v58, %v621_v57 }
  0xc8   : > { %1854 = vmatmul.msk.bf16.gmra.mxu1 %vm737_vm3, %v683_v59 }
  0xcb   : > { %v472_v63 = vpop.f32.mrf.mxu0 }
  0xcc   : > { %v623_v1 = vmax.f32 %v472_v63, 0.0  ;;  %v276_v63 = vld [vmem:[%s2217_s7 + $0x128] sm:$0xff] }
  0xce   : > { %1815 = vmatmul.msk.bf16.gmra.mxu0 %vm344_vm2, %v314_v62  ;;  %v275_v62 = vld [vmem:[%s2217_s7 + $0x120] sm:$0xff] }
  0xd3   : > { %v474_v0 = vpop.f32.mrf.mxu0 }
  0xd4   : > { %v624_v2 = vmax.f32 %v474_v0, 0.0  ;;  %v321_v0 = vpack.c.bf16 %v276_v63, %v275_v62 }
  0xd6   : > { %v684_v3 = vpack.c.bf16 %v624_v2, %v623_v1 }
  0xd8   : > { %1855 = vmatmul.msk.bf16.gmra.mxu1 %vm737_vm3, %v684_v3 }
  0xdb   : > { %v477_v7 = vpop.f32.mrf.mxu0 }
  0xdc   : > { %v625_v9 = vmax.f32 %v477_v7, 0.0 }
  0xde   : > { %1816 = vmatmul.msk.bf16.gmra.mxu0 %vm344_vm2, %v315_v6 }
  0xe3   : > { %v479_v8 = vpop.f32.mrf.mxu0 }
  0xe4   : > { %v626_v10 = vmax.f32 %v479_v8, 0.0 }
  0xe6   : > { %v685_v11 = vpack.c.bf16 %v626_v10, %v625_v9 }
  0xe8   : > { %1856 = vmatmul.msk.bf16.gmra.mxu1 %vm737_vm3, %v685_v11  ;;  %v277_v11 = vld [vmem:[%s2217_s7 + $0x130] sm:$0xff] }
  0xe9   : > { %v322_v13 = vpack.c.bf16 %v278_v12, %v277_v11  ;;  %v292_v11 = vld [vmem:[%s2217_s7 + $0x1a8] sm:$0xff] }
  0xeb   : > { %v482_v15 = vpop.f32.mrf.mxu0 }
  0xec   : > { %v627_v17 = vmax.f32 %v482_v15, 0.0 }
  0xee   : > { %1817 = vmatmul.msk.bf16.gmra.mxu0 %vm344_vm2, %v316_v14 }
  0xf3   : > { %v484_v16 = vpop.f32.mrf.mxu0 }
  0xf4   : > { %v628_v18 = vmax.f32 %v484_v16, 0.0 }
  0xf6   : > { %v686_v19 = vpack.c.bf16 %v628_v18, %v627_v17 }
  0xf8   : > { %1857 = vmatmul.msk.bf16.gmra.mxu1 %vm737_vm3, %v686_v19 }
  0xfb   : > { %v487_v23 = vpop.f32.mrf.mxu0 }
  0xfc   : > { %v629_v26 = vmax.f32 %v487_v23, 0.0 }
  0xfe   : > { %1818 = vmatmul.msk.bf16.gmra.mxu0 %vm344_vm2, %v317_v22 }
 0x103   : > { %v489_v25 = vpop.f32.mrf.mxu0 }
 0x104   : > { %v630_v27 = vmax.f32 %v489_v25, 0.0  ;;  %v279_v25 = vld [vmem:[%s2217_s7 + $0x140] sm:$0xff] }
 0x106   : > { %v687_v29 = vpack.c.bf16 %v630_v27, %v629_v26  ;;  %v280_v26 = vld [vmem:[%s2217_s7 + $0x148] sm:$0xff] }
 0x107   : > { %v323_v27 = vpack.c.bf16 %v280_v26, %v279_v25  ;;  %v294_v25 = vld [vmem:[%s2217_s7 + $0x1b8] sm:$0xff] }
 0x108   : > { %1858 = vmatmul.msk.bf16.gmra.mxu1 %vm737_vm3, %v687_v29 }
 0x10b   : > { %v492_v34 = vpop.f32.mrf.mxu0 }
 0x10c   : > { %v631_v37 = vmax.f32 %v492_v34, 0.0 }
 0x10e   : > { %1819 = vmatmul.msk.bf16.gmra.mxu0 %vm344_vm2, %v318_v33 }
 0x113   : > { %v494_v36 = vpop.f32.mrf.mxu0 }
 0x114   : > { %v632_v38 = vmax.f32 %v494_v36, 0.0 }
 0x116   : > { %v688_v39 = vpack.c.bf16 %v632_v38, %v631_v37 }
 0x118   : > { %1859 = vmatmul.msk.bf16.gmra.mxu1 %vm737_vm3, %v688_v39 }
 0x11b   : > { %v497_v43 = vpop.f32.mrf.mxu0 }
 0x11c   : > { %v633_v45 = vmax.f32 %v497_v43, 0.0 }
 0x11e   : > { %1820 = vmatmul.msk.bf16.gmra.mxu0 %vm344_vm2, %v319_v42  ;;  %v282_v42 = vld [vmem:[%s2217_s7 + $0x158] sm:$0xff] }
 0x11f   : > { %v324_v43 = vpack.c.bf16 %v282_v42, %v281_v41  ;;  %v296_v41 = vld [vmem:[%s2217_s7 + $0x1c8] sm:$0xff] }
 0x123   : > { %v499_v44 = vpop.f32.mrf.mxu0 }
 0x124   : > { %v634_v46 = vmax.f32 %v499_v44, 0.0 }
 0x125   : > { %v843_v47 = vpop.f32.mrf.mxu1 }
 0x126   : > { %v689_v48 = vpack.c.bf16 %v634_v46, %v633_v45  ;;  %v1003_v54 = vmax.f32 %v843_v47, 0.0 }
 0x128   : > { %1860 = vmatmul.msk.bf16.gmra.mxu1 %vm737_vm3, %v689_v48 }
 0x12b   : > { %v502_v52 = vpop.f32.mrf.mxu0 }
 0x12c   : > { %v635_v58 = vmax.f32 %v502_v52, 0.0 }
 0x12d   : > { %v845_v53 = vpop.f32.mrf.mxu1 }
 0x12e   : > { %v1004_v55 = vmax.f32 %v845_v53, 0.0  ;;  %1821 = vmatmul.msk.bf16.gmra.mxu0 %vm344_vm2, %v320_v51 }
 0x130   : > { %v1067_v56 = vpack.c.bf16 %v1004_v55, %v1003_v54  ;;  %v283_v54 = vld [vmem:[%s2217_s7 + $0x160] sm:$0xff]  ;;  %v284_v55 = vld [vmem:[%s2217_s7 + $0x168] sm:$0xff] }
 0x132   : > { %1900 = vmatmul.msk.bf16.vlgmr.msra.gmra.mxu2 %vm737_vm3, %v1067_v56  ;;  %v325_v56 = vpack.c.bf16 %v284_v55, %v283_v54  ;;  %v297_v55 = vld [vmem:[%s2217_s7 + $0x1d0] sm:$0xff] }
 0x133   : > { %v504_v57 = vpop.f32.mrf.mxu0 }
 0x134   : > { %v636_v59 = vmax.f32 %v504_v57, 0.0 }
 0x135   : > { %v848_v60 = vpop.f32.mrf.mxu1 }
 0x136   : > { %v690_v61 = vpack.c.bf16 %v636_v59, %v635_v58  ;;  %v1005_v3 = vmax.f32 %v848_v60, 0.0  ;;  %v289_v59 = vld [vmem:[%s2217_s7 + $0x190] sm:$0xff]  ;;  %v290_v60 = vld [vmem:[%s2217_s7 + $0x198] sm:$0xff] }
 0x137   : > { %v328_v63 = vpack.c.bf16 %v290_v60, %v289_v59 }
 0x138   : > { %1861 = vmatmul.msk.bf16.gmra.mxu1 %vm737_vm3, %v690_v61 }
 0x139   : > { %1829 = vmatmul.msk.bf16.vlgmr.msra.gmra.mxu3 %vm344_vm2, %v328_v63 }
 0x13a   : > { %1967 = vmatpush.bf16.msra.mxu3 %v2285_v24  ;;  %v291_v24 = vld [vmem:[%s2217_s7 + $0x1a0] sm:$0xff] }
 0x13b   : > { %v507_v1 = vpop.f32.mrf.mxu0 }
 0x13c   : > { %v637_v7 = vmax.f32 %v507_v1, 0.0 }
 0x13d   : > { %v850_v2 = vpop.f32.mrf.mxu1 }
 0x13e   : > { %v1006_v4 = vmax.f32 %v850_v2, 0.0  ;;  %1822 = vmatmul.msk.bf16.gmra.mxu0 %vm344_vm2, %v321_v0  ;;  %1968 = vmatpush.bf16.msra.mxu3 %v2291_v28  ;;  %v329_v28 = vpack.c.bf16 %v292_v11, %v291_v24 }
 0x140   : > { %v1068_v5 = vpack.c.bf16 %v1006_v4, %v1005_v3 }
 0x142   : > { %1901 = vmatmul.msk.bf16.gmra.mxu2 %vm737_vm3, %v1068_v5  ;;  %1969 = vmatpush.bf16.msra.mxu3 %v2300_v32 }
 0x143   : > { %v509_v6 = vpop.f32.mrf.mxu0 }
 0x144   : > { %v638_v8 = vmax.f32 %v509_v6, 0.0  ;;  %v285_v6 = vld [vmem:[%s2217_s7 + $0x170] sm:$0xff] }
 0x145   : > { %v853_v9 = vpop.f32.mrf.mxu1 }
 0x146   : > { %v691_v10 = vpack.c.bf16 %v638_v8, %v637_v7  ;;  %v1007_v16 = vmax.f32 %v853_v9, 0.0  ;;  %v286_v7 = vld [vmem:[%s2217_s7 + $0x178] sm:$0xff]  ;;  %1970 = vmatpush.bf16.msra.mxu3 %v2306_v35 }
 0x147   : > { %v326_v8 = vpack.c.bf16 %v286_v7, %v285_v6  ;;  %v299_v6 = vld [vmem:[%s2217_s7 + $0x1e0] sm:$0xff]  ;;  %v300_v7 = vld [vmem:[%s2217_s7 + $0x1e8] sm:$0xff] }
 0x148   : > { %1862 = vmatmul.msk.bf16.gmra.mxu1 %vm737_vm3, %v691_v10 }
 0x149   : > { %1830 = vmatmul.msk.bf16.gmra.mxu3 %vm344_vm2, %v329_v28 }
 0x14b   : > { %v512_v14 = vpop.f32.mrf.mxu0 }
 0x14c   : > { %v639_v20 = vmax.f32 %v512_v14, 0.0 }
 0x14d   : > { %v855_v15 = vpop.f32.mrf.mxu1 }
 0x14e   : > { %v1008_v17 = vmax.f32 %v855_v15, 0.0  ;;  %1823 = vmatmul.msk.bf16.gmra.mxu0 %vm344_vm2, %v322_v13 }
 0x150   : > { %v1069_v18 = vpack.c.bf16 %v1008_v17, %v1007_v16 }
 0x152   : > { %1902 = vmatmul.msk.bf16.gmra.mxu2 %vm737_vm3, %v1069_v18 }
 0x153   : > { %v514_v19 = vpop.f32.mrf.mxu0 }
 0x154   : > { %v640_v21 = vmax.f32 %v514_v19, 0.0  ;;  %v287_v19 = vld [vmem:[%s2217_s7 + $0x180] sm:$0xff] }
 0x155   : > { %v858_v22 = vpop.f32.mrf.mxu1 }
 0x156   : > { %v692_v23 = vpack.c.bf16 %v640_v21, %v639_v20  ;;  %v1009_v31 = vmax.f32 %v858_v22, 0.0  ;;  %v288_v20 = vld [vmem:[%s2217_s7 + $0x188] sm:$0xff] }
 0x157   : > { %v327_v35 = vpack.c.bf16 %v288_v20, %v287_v19  ;;  %v302_v19 = vld [vmem:[%s2217_s7 + $0x1f8] sm:$0xff] }
 0x158   : > { %1863 = vmatmul.msk.bf16.gmra.mxu1 %vm737_vm3, %v692_v23  ;;  %v293_v23 = vld [vmem:[%s2217_s7 + $0x1b0] sm:$0xff] }
 0x15b   : > { %v517_v29 = vpop.f32.mrf.mxu0 }
 0x15c   : > { %v641_v37 = vmax.f32 %v517_v29, 0.0  ;;  %v330_v29 = vpack.c.bf16 %v294_v25, %v293_v23 }
 0x15d   : > { %v860_v30 = vpop.f32.mrf.mxu1 }
 0x15e   : > { %v1010_v33 = vmax.f32 %v860_v30, 0.0  ;;  %1824 = vmatmul.msk.bf16.gmra.mxu0 %vm344_vm2, %v323_v27  ;;  %1831 = vmatmul.msk.bf16.gmra.mxu3 %vm344_vm2, %v330_v29 }
 0x160   : > { %v1070_v34 = vpack.c.bf16 %v1010_v33, %v1009_v31 }
 0x162   : > { %1903 = vmatmul.msk.bf16.gmra.mxu2 %vm737_vm3, %v1070_v34 }
 0x163   : > { %v519_v36 = vpop.f32.mrf.mxu0 }
 0x164   : > { %v642_v38 = vmax.f32 %v519_v36, 0.0 }
 0x165   : > { %v863_v39 = vpop.f32.mrf.mxu1 }
 0x166   : > { %v693_v40 = vpack.c.bf16 %v642_v38, %v641_v37  ;;  %v1011_v46 = vmax.f32 %v863_v39, 0.0 }
 0x168   : > { %1864 = vmatmul.msk.bf16.gmra.mxu1 %vm737_vm3, %v693_v40  ;;  %v295_v40 = vld [vmem:[%s2217_s7 + $0x1c0] sm:$0xff] }
 0x16b   : > { %v522_v44 = vpop.f32.mrf.mxu0 }
 0x16c   : > { %v643_v50 = vmax.f32 %v522_v44, 0.0  ;;  %v331_v44 = vpack.c.bf16 %v296_v41, %v295_v40 }
 0x16d   : > { %v865_v45 = vpop.f32.mrf.mxu1 }
 0x16e   : > { %v1012_v47 = vmax.f32 %v865_v45, 0.0  ;;  %1825 = vmatmul.msk.bf16.gmra.mxu0 %vm344_vm2, %v324_v43  ;;  %1832 = vmatmul.msk.bf16.gmra.mxu3 %vm344_vm2, %v331_v44 }
 0x170   : > { %v1071_v48 = vpack.c.bf16 %v1012_v47, %v1011_v46 }
 0x172   : > { %1904 = vmatmul.msk.bf16.gmra.mxu2 %vm737_vm3, %v1071_v48 }
 0x173   : > { %v524_v49 = vpop.f32.mrf.mxu0 }
 0x174   : > { %v644_v51 = vmax.f32 %v524_v49, 0.0 }
 0x175   : > { %v868_v52 = vpop.f32.mrf.mxu1 }
 0x176   : > { %v694_v53 = vpack.c.bf16 %v644_v51, %v643_v50  ;;  %v1013_v61 = vmax.f32 %v868_v52, 0.0 }
 0x178   : > { %1865 = vmatmul.msk.bf16.gmra.mxu1 %vm737_vm3, %v694_v53 }
 0x17b   : > { %v527_v57 = vpop.f32.mrf.mxu0 }
 0x17c   : > { %v645_v2 = vmax.f32 %v527_v57, 0.0 }
 0x17d   : > { %v870_v58 = vpop.f32.mrf.mxu1 }
 0x17e   : > { %v1014_v62 = vmax.f32 %v870_v58, 0.0  ;;  %1826 = vmatmul.msk.bf16.gmra.mxu0 %vm344_vm2, %v325_v56  ;;  %v298_v56 = vld [vmem:[%s2217_s7 + $0x1d8] sm:$0xff] }
 0x17f   : > { %v332_v59 = vpack.c.bf16 %v298_v56, %v297_v55 }
 0x180   : > { %v1072_v0 = vpack.c.bf16 %v1014_v62, %v1013_v61 }
 0x181   : > { %1833 = vmatmul.msk.bf16.gmra.mxu3 %vm344_vm2, %v332_v59 }
 0x182   : > { %1905 = vmatmul.msk.bf16.gmra.mxu2 %vm737_vm3, %v1072_v0 }
 0x183   : > { %v529_v1 = vpop.f32.mrf.mxu0 }
 0x184   : > { %v646_v3 = vmax.f32 %v529_v1, 0.0 }
 0x185   : > { %v873_v4 = vpop.f32.mrf.mxu1 }
 0x186   : > { %v695_v5 = vpack.c.bf16 %v646_v3, %v645_v2  ;;  %v1015_v12 = vmax.f32 %v873_v4, 0.0 }
 0x188   : > { %1866 = vmatmul.msk.bf16.gmra.mxu1 %vm737_vm3, %v695_v5 }
 0x18b   : > { %v532_v9 = vpop.f32.mrf.mxu0 }
 0x18c   : > { %v647_v15 = vmax.f32 %v532_v9, 0.0 }
 0x18d   : > { %v875_v10 = vpop.f32.mrf.mxu1 }
 0x18e   : > { %v1016_v13 = vmax.f32 %v875_v10, 0.0  ;;  %1827 = vmatmul.msk.bf16.gmra.mxu0 %vm344_vm2, %v326_v8  ;;  %v333_v10 = vpack.c.bf16 %v300_v7, %v299_v6 }
 0x190   : > { %v1073_v14 = vpack.c.bf16 %v1016_v13, %v1015_v12 }
 0x191   : > { %1834 = vmatmul.msk.bf16.gmra.mxu3 %vm344_vm2, %v333_v10 }
 0x192   : > { %1906 = vmatmul.msk.bf16.gmra.mxu2 %vm737_vm3, %v1073_v14 }
 0x193   : > { %v534_v32 = vpop.f32.mrf.mxu0 }
 0x194   : > { %v648_v16 = vmax.f32 %v534_v32, 0.0 }
 0x195   : > { %v878_v17 = vpop.f32.mrf.mxu1 }
 0x196   : > { %v696_v18 = vpack.c.bf16 %v648_v16, %v647_v15  ;;  %v1017_v26 = vmax.f32 %v878_v17, 0.0 }
 0x198   : > { %1867 = vmatmul.msk.bf16.gmra.mxu1 %vm737_vm3, %v696_v18  ;;  %v301_v18 = vld [vmem:[%s2217_s7 + $0x1f0] sm:$0xff]  ;;  %s1461_s7 = ssub.s32 (%p2199_p4), 125, %s2207_s26 }
 0x199   : > { %p1462_p8 = scmp.lt.s32.totalorder (%p2199_p4), %s1461_s7, 64 }
 0x19b   : > { %v537_v21 = vpop.f32.mrf.mxu0 }
 0x19c   : > { %v649_v33 = vmax.f32 %v537_v21, 0.0  ;;  %v334_v21 = vpack.c.bf16 %v302_v19, %v301_v18 }
 0x19d   : > { %v880_v22 = vpop.f32.mrf.mxu1 }
 0x19e   : > { %v1018_v27 = vmax.f32 %v880_v22, 0.0  ;;  %1828 = vmatmul.msk.bf16.gmra.mxu0 %vm344_vm2, %v327_v35 }
 0x1a0   : > { %v1074_v30 = vpack.c.bf16 %v1018_v27, %v1017_v26 }
 0x1a1   : > { %1835 = vmatmul.msk.bf16.gmra.mxu3 %vm344_vm2, %v334_v21 }
 0x1a2   : > { %1907 = vmatmul.msk.bf16.gmra.mxu2 %vm737_vm3, %v1074_v30 }
 0x1a3   : > { %v539_v31 = vpop.f32.mrf.mxu0 }
 0x1a4   : > { %v650_v34 = vmax.f32 %v539_v31, 0.0 }
 0x1a5   : > { %v883_v36 = vpop.f32.mrf.mxu1 }
 0x1a6   : > { %v697_v37 = vpack.c.bf16 %v650_v34, %v649_v33  ;;  %v1019_v42 = vmax.f32 %v883_v36, 0.0 }
 0x1a8   : > { %1868 = vmatmul.msk.bf16.gmra.mxu1 %vm737_vm3, %v697_v37 }
 0x1ab   : > { %v542_v38 = vpop.f32.mrf.mxu0 }
 0x1ac   : > { %v651_v47 = vmax.f32 %v542_v38, 0.0 }
 0x1ad   : > { %v885_v39 = vpop.f32.mrf.mxu1 }
 0x1ae   : > { %v1020_v43 = vmax.f32 %v885_v39, 0.0 }
 0x1b0   : > { %v1075_v45 = vpack.c.bf16 %v1020_v43, %v1019_v42 }
 0x1b2   : > { %1908 = vmatmul.msk.bf16.gmra.mxu2 %vm737_vm3, %v1075_v45 }
 0x1b3   : > { %v544_v46 = vpop.f32.mrf.mxu0 }
 0x1b4   : > { %v652_v48 = vmax.f32 %v544_v46, 0.0 }
 0x1b5   : > { %v888_v49 = vpop.f32.mrf.mxu1  ;;  %v1228_v50 = vpop.f32.mrf.mxu2 }
 0x1b6   : > { %v698_v51 = vpack.c.bf16 %v652_v48, %v651_v47  ;;  %1389 = vst.msk [vmem:[%s2373_s15] sm:$0xff] %vm1388_vm4, %v1228_v50  ;;  %v1021_v57 = vmax.f32 %v888_v49, 0.0 }
 0x1b8   : > { %1869 = vmatmul.msk.bf16.gmra.mxu1 %vm737_vm3, %v698_v51 }
 0x1bb   : > { %v547_v52 = vpop.f32.mrf.mxu0 }
 0x1bc   : > { %v653_v62 = vmax.f32 %v547_v52, 0.0 }
 0x1bd   : > { %v890_v53 = vpop.f32.mrf.mxu1  ;;  %v1230_v54 = vpop.f32.mrf.mxu2 }
 0x1be   : > { %v1022_v58 = vmax.f32 %v890_v53, 0.0  ;;  %1390 = vst.msk [vmem:[%s2373_s15 + $0x8] sm:$0xff] %vm1388_vm4, %v1230_v54 }
 0x1c0   : > { %v1076_v60 = vpack.c.bf16 %v1022_v58, %v1021_v57  ;;  %v582_v58 = vpop.f32.mrf.mxu3 }
 0x1c2   : > { %1909 = vmatmul.msk.bf16.gmra.mxu2 %vm737_vm3, %v1076_v60 }
 0x1c3   : > { %v549_v61 = vpop.f32.mrf.mxu0 }
 0x1c4   : > { %v654_v63 = vmax.f32 %v549_v61, 0.0 }
 0x1c5   : > { %v893_v0 = vpop.f32.mrf.mxu1  ;;  %v1233_v1 = vpop.f32.mrf.mxu2 }
 0x1c6   : > { %v699_v2 = vpack.c.bf16 %v654_v63, %v653_v62  ;;  %1391 = vst.msk [vmem:[%s2373_s15 + $0x10] sm:$0xff] %vm1388_vm4, %v1233_v1  ;;  %v1023_v8 = vmax.f32 %v893_v0, 0.0 }
 0x1c8   : > { %1870 = vmatmul.msk.bf16.gmra.mxu1 %vm737_vm3, %v699_v2  ;;  %v584_v6 = vpop.f32.mrf.mxu3 }
 0x1cb   : > { %v552_v3 = vpop.f32.mrf.mxu0 }
 0x1cc   : > { %v655_v12 = vmax.f32 %v552_v3, 0.0 }
 0x1cd   : > { %v895_v4 = vpop.f32.mrf.mxu1  ;;  %v1235_v5 = vpop.f32.mrf.mxu2 }
 0x1ce   : > { %v1024_v9 = vmax.f32 %v895_v4, 0.0  ;;  %1392 = vst.msk [vmem:[%s2373_s15 + $0x18] sm:$0xff] %vm1388_vm4, %v1235_v5 }
 0x1d0   : > { %v1077_v24 = vpack.c.bf16 %v1024_v9, %v1023_v8 }
 0x1d2   : > { %1910 = vmatmul.msk.bf16.gmra.mxu2 %vm737_vm3, %v1077_v24 }
 0x1d3   : > { %v554_v11 = vpop.f32.mrf.mxu0 }
 0x1d4   : > { %v656_v13 = vmax.f32 %v554_v11, 0.0 }
 0x1d5   : > { %v898_v28 = vpop.f32.mrf.mxu1  ;;  %v1238_v14 = vpop.f32.mrf.mxu2 }
 0x1d6   : > { %v700_v32 = vpack.c.bf16 %v656_v13, %v655_v12  ;;  %1393 = vst.msk [vmem:[%s2373_s15 + $0x20] sm:$0xff] %vm1388_vm4, %v1238_v14  ;;  %v1025_v20 = vmax.f32 %v898_v28, 0.0  ;;  %v587_v12 = vpop.f32.mrf.mxu3 }
 0x1d8   : > { %1871 = vmatmul.msk.bf16.gmra.mxu1 %vm737_vm3, %v700_v32 }
 0x1db   : > { %v557_v15 = vpop.f32.mrf.mxu0 }
 0x1dc   : > { %v657_v25 = vmax.f32 %v557_v15, 0.0 }
 0x1dd   : > { %v900_v16 = vpop.f32.mrf.mxu1  ;;  %v1240_v17 = vpop.f32.mrf.mxu2 }
 0x1de   : > { %v1026_v35 = vmax.f32 %v900_v16, 0.0  ;;  %1394 = vst.msk [vmem:[%s2373_s15 + $0x28] sm:$0xff] %vm1388_vm4, %v1240_v17  ;;  %v589_v17 = vpop.f32.mrf.mxu3 }
 0x1e0   : > { %v1078_v22 = vpack.c.bf16 %v1026_v35, %v1025_v20 }
 0x1e2   : > { %1911 = vmatmul.msk.bf16.gmra.mxu2 %vm737_vm3, %v1078_v22  ;;  %v667_v22 = vmax.f32 %v582_v58, 0.0 }
 0x1e3   : > { %v559_v23 = vpop.f32.mrf.mxu0 }
 0x1e4   : > { %v658_v26 = vmax.f32 %v559_v23, 0.0  ;;  %v668_v23 = vmax.f32 %v584_v6, 0.0 }
 0x1e5   : > { %v903_v27 = vpop.f32.mrf.mxu1  ;;  %v1243_v29 = vpop.f32.mrf.mxu2 }
 0x1e6   : > { %v701_v30 = vpack.c.bf16 %v658_v26, %v657_v25  ;;  %1395 = vst.msk [vmem:[%s2373_s15 + $0x30] sm:$0xff] %vm1388_vm4, %v1243_v29  ;;  %v1027_v36 = vmax.f32 %v903_v27, 0.0  ;;  %v592_v25 = vpop.f32.mrf.mxu3  ;;  %v706_v29 = vpack.c.bf16 %v668_v23, %v667_v22 }
 0x1e8   : > { %1872 = vmatmul.msk.bf16.gmra.mxu1 %vm737_vm3, %v701_v30 }
 0x1eb   : > { %v562_v31 = vpop.f32.mrf.mxu0 }
 0x1ec   : > { %v659_v40 = vmax.f32 %v562_v31, 0.0 }
 0x1ed   : > { %v905_v33 = vpop.f32.mrf.mxu1  ;;  %v1245_v34 = vpop.f32.mrf.mxu2 }
 0x1ee   : > { %v1028_v37 = vmax.f32 %v905_v33, 0.0  ;;  %1396 = vst.msk [vmem:[%s2373_s15 + $0x38] sm:$0xff] %vm1388_vm4, %v1245_v34 }
 0x1f0   : > { %v1079_v38 = vpack.c.bf16 %v1028_v37, %v1027_v36  ;;  %v594_v36 = vpop.f32.mrf.mxu3 }
 0x1f2   : > { %1912 = vmatmul.msk.bf16.gmra.mxu2 %vm737_vm3, %v1079_v38  ;;  %v669_v38 = vmax.f32 %v587_v12, 0.0 }
 0x1f3   : > { %v564_v39 = vpop.f32.mrf.mxu0 }
 0x1f4   : > { %v660_v41 = vmax.f32 %v564_v39, 0.0  ;;  %v670_v39 = vmax.f32 %v589_v17, 0.0 }
 0x1f5   : > { %v908_v42 = vpop.f32.mrf.mxu1  ;;  %v1248_v43 = vpop.f32.mrf.mxu2 }
 0x1f6   : > { %v702_v44 = vpack.c.bf16 %v660_v41, %v659_v40  ;;  %1397 = vst.msk [vmem:[%s2373_s15 + $0x40] sm:$0xff] %vm1388_vm4, %v1248_v43  ;;  %v1029_v48 = vmax.f32 %v908_v42, 0.0  ;;  %v707_v42 = vpack.c.bf16 %v670_v39, %v669_v38 }
 0x1f8   : > { %1873 = vmatmul.msk.bf16.gmra.mxu1 %vm737_vm3, %v702_v44  ;;  %v597_v43 = vpop.f32.mrf.mxu3 }
 0x1fb   : > { %v567_v45 = vpop.f32.mrf.mxu0 }
 0x1fc   : > { %v661_v52 = vmax.f32 %v567_v45, 0.0 }
 0x1fd   : > { %v910_v46 = vpop.f32.mrf.mxu1  ;;  %v1250_v47 = vpop.f32.mrf.mxu2 }
 0x1fe   : > { %v1030_v49 = vmax.f32 %v910_v46, 0.0  ;;  %1398 = vst.msk [vmem:[%s2373_s15 + $0x48] sm:$0xff] %vm1388_vm4, %v1250_v47 }
 0x200   : > { %v1080_v50 = vpack.c.bf16 %v1030_v49, %v1029_v48  ;;  %v671_v49 = vmax.f32 %v592_v25, 0.0 }
 0x202   : > { %1913 = vmatmul.msk.bf16.gmra.mxu2 %vm737_vm3, %v1080_v50  ;;  %v672_v50 = vmax.f32 %v594_v36, 0.0 }
 0x203   : > { %v569_v51 = vpop.f32.mrf.mxu0 }
 0x204   : > { %v662_v53 = vmax.f32 %v569_v51, 0.0  ;;  %v599_v51 = vpop.f32.mrf.mxu3 }
 0x205   : > { %v913_v54 = vpop.f32.mrf.mxu1  ;;  %v1253_v55 = vpop.f32.mrf.mxu2 }
 0x206   : > { %v703_v56 = vpack.c.bf16 %v662_v53, %v661_v52  ;;  %1399 = vst.msk [vmem:[%s2373_s15 + $0x50] sm:$0xff] %vm1388_vm4, %v1253_v55  ;;  %v1031_v61 = vmax.f32 %v913_v54, 0.0  ;;  %v708_v54 = vpack.c.bf16 %v672_v50, %v671_v49 }
 0x208   : > { %1874 = vmatmul.msk.bf16.gmra.mxu1 %vm737_vm3, %v703_v56 }
 0x20b   : > { %v572_v57 = vpop.f32.mrf.mxu0 }
 0x20c   : > { %v663_v1 = vmax.f32 %v572_v57, 0.0  ;;  %v602_v55 = vpop.f32.mrf.mxu3 }
 0x20d   : > { %v915_v59 = vpop.f32.mrf.mxu1  ;;  %v1255_v60 = vpop.f32.mrf.mxu2 }
 0x20e   : > { %v1032_v62 = vmax.f32 %v915_v59, 0.0  ;;  %1400 = vst.msk [vmem:[%s2373_s15 + $0x58] sm:$0xff] %vm1388_vm4, %v1255_v60 }
 0x210   : > { %v1081_v63 = vpack.c.bf16 %v1032_v62, %v1031_v61  ;;  %v673_v61 = vmax.f32 %v597_v43, 0.0  ;;  %v674_v62 = vmax.f32 %v599_v51, 0.0 }
 0x212   : > { %1914 = vmatmul.msk.bf16.gmra.mxu2 %vm737_vm3, %v1081_v63 }
 0x213   : > { %v574_v0 = vpop.f32.mrf.mxu0 }
 0x214   : > { %v664_v2 = vmax.f32 %v574_v0, 0.0 }
 0x215   : > { %v918_v3 = vpop.f32.mrf.mxu1  ;;  %v1258_v4 = vpop.f32.mrf.mxu2 }
 0x216   : > { %v704_v5 = vpack.c.bf16 %v664_v2, %v663_v1  ;;  %1401 = vst.msk [vmem:[%s2373_s15 + $0x60] sm:$0xff] %vm1388_vm4, %v1258_v4  ;;  %v1033_v10 = vmax.f32 %v918_v3, 0.0  ;;  %v709_v1 = vpack.c.bf16 %v674_v62, %v673_v61  ;;  %v604_v2 = vpop.f32.mrf.mxu3 }
 0x218   : > { %1875 = vmatmul.msk.bf16.gmra.mxu1 %vm737_vm3, %v704_v5 }
 0x21b   : > { %v577_v7 = vpop.f32.mrf.mxu0 }
 0x21c   : > { %v665_v28 = vmax.f32 %v577_v7, 0.0 }
 0x21d   : > { %v920_v8 = vpop.f32.mrf.mxu1  ;;  %v1260_v9 = vpop.f32.mrf.mxu2 }
 0x21e   : > { %v1034_v24 = vmax.f32 %v920_v8, 0.0  ;;  %1402 = vst.msk [vmem:[%s2373_s15 + $0x68] sm:$0xff] %vm1388_vm4, %v1260_v9  ;;  %v607_v8 = vpop.f32.mrf.mxu3  ;;  %v675_v9 = vmax.f32 %v602_v55, 0.0 }
 0x21f   : > { %v677_v17 = vmax.f32 %v607_v8, 0.0 }
 0x220   : > { %v1082_v11 = vpack.c.bf16 %v1034_v24, %v1033_v10  ;;  %v676_v10 = vmax.f32 %v604_v2, 0.0 }
 0x222   : > { %1915 = vmatmul.msk.bf16.gmra.mxu2 %vm737_vm3, %v1082_v11  ;;  %v710_v12 = vpack.c.bf16 %v676_v10, %v675_v9 }
 0x223   : > { %v579_v13 = vpop.f32.mrf.mxu0 }
 0x224   : > { %v666_v14 = vmax.f32 %v579_v13, 0.0 }
 0x225   : > { %v923_v32 = vpop.f32.mrf.mxu1  ;;  %v1263_v15 = vpop.f32.mrf.mxu2 }
 0x226   : > { %v705_v16 = vpack.c.bf16 %v666_v14, %v665_v28  ;;  %1403 = vst.msk [vmem:[%s2373_s15 + $0x70] sm:$0xff] %vm1388_vm4, %v1263_v15  ;;  %v1035_v20 = vmax.f32 %v923_v32, 0.0  ;;  %v609_v13 = vpop.f32.mrf.mxu3 }
 0x228   : > { %1876 = vmatmul.msk.bf16.vlgmr.msrb.gmra.mxu3 %vm737_vm3, %v705_v16 }
 0x22d   : > { %v925_v18 = vpop.f32.mrf.mxu1  ;;  %v1265_v19 = vpop.f32.mrf.mxu2 }
 0x22e   : > { %v1036_v35 = vmax.f32 %v925_v18, 0.0  ;;  %1404 = vst.msk [vmem:[%s2373_s15 + $0x78] sm:$0xff] %vm1388_vm4, %v1265_v19  ;;  %v678_v18 = vmax.f32 %v609_v13, 0.0  ;;  %v612_v19 = vpop.f32.mrf.mxu3 }
 0x230   : > { %v1083_v21 = vpack.c.bf16 %v1036_v35, %v1035_v20 }
 0x232   : > { %1916 = vmatmul.msk.bf16.gmra.mxu2 %vm737_vm3, %v1083_v21  ;;  %v711_v21 = vpack.c.bf16 %v678_v18, %v677_v17 }
 0x235   : > { %v928_v26 = vpop.f32.mrf.mxu1  ;;  %v1268_v27 = vpop.f32.mrf.mxu2 }
 0x236   : > { %1405 = vst.msk [vmem:[%s2373_s15 + $0x80] sm:$0xff] %vm1388_vm4, %v1268_v27  ;;  %v1037_v33 = vmax.f32 %v928_v26, 0.0  ;;  %v614_v27 = vpop.f32.mrf.mxu3 }
 0x238   : > { %1877 = vmatmul.msk.bf16.gmra.mxu3 %vm737_vm3, %v706_v29 }
 0x23d   : > { %v930_v30 = vpop.f32.mrf.mxu1  ;;  %v1270_v31 = vpop.f32.mrf.mxu2 }
 0x23e   : > { %v1038_v34 = vmax.f32 %v930_v30, 0.0  ;;  %1406 = vst.msk [vmem:[%s2373_s15 + $0x88] sm:$0xff] %vm1388_vm4, %v1270_v31  ;;  %v679_v30 = vmax.f32 %v612_v19, 0.0  ;;  %v680_v31 = vmax.f32 %v614_v27, 0.0 }
 0x240   : > { %v1084_v37 = vpack.c.bf16 %v1038_v34, %v1037_v33  ;;  %v712_v36 = vpack.c.bf16 %v680_v31, %v679_v30 }
 0x242   : > { %1917 = vmatmul.msk.bf16.gmra.mxu2 %vm737_vm3, %v1084_v37 }
 0x245   : > { %v933_v40 = vpop.f32.mrf.mxu1  ;;  %v1273_v41 = vpop.f32.mrf.mxu2 }
 0x246   : > { %1407 = vst.msk [vmem:[%s2373_s15 + $0x90] sm:$0xff] %vm1388_vm4, %v1273_v41  ;;  %v1039_v46 = vmax.f32 %v933_v40, 0.0 }
 0x248   : > { %1878 = vmatmul.msk.bf16.gmra.mxu3 %vm737_vm3, %v707_v42 }
 0x24d   : > { %v935_v44 = vpop.f32.mrf.mxu1  ;;  %v1275_v45 = vpop.f32.mrf.mxu2 }
 0x24e   : > { %v1040_v47 = vmax.f32 %v935_v44, 0.0  ;;  %1408 = vst.msk [vmem:[%s2373_s15 + $0x98] sm:$0xff] %vm1388_vm4, %v1275_v45 }
 0x250   : > { %v1085_v48 = vpack.c.bf16 %v1040_v47, %v1039_v46 }
 0x252   : > { %1918 = vmatmul.msk.bf16.gmra.mxu2 %vm737_vm3, %v1085_v48 }
 0x255   : > { %v938_v52 = vpop.f32.mrf.mxu1  ;;  %v1278_v53 = vpop.f32.mrf.mxu2 }
 0x256   : > { %1409 = vst.msk [vmem:[%s2373_s15 + $0xa0] sm:$0xff] %vm1388_vm4, %v1278_v53  ;;  %v1041_v58 = vmax.f32 %v938_v52, 0.0 }
 0x258   : > { %1879 = vmatmul.msk.bf16.gmra.mxu3 %vm737_vm3, %v708_v54 }
 0x25d   : > { %v940_v56 = vpop.f32.mrf.mxu1  ;;  %v1280_v57 = vpop.f32.mrf.mxu2 }
 0x25e   : > { %v1042_v59 = vmax.f32 %v940_v56, 0.0  ;;  %1410 = vst.msk [vmem:[%s2373_s15 + $0xa8] sm:$0xff] %vm1388_vm4, %v1280_v57 }
 0x260   : > { %v1086_v60 = vpack.c.bf16 %v1042_v59, %v1041_v58 }
 0x262   : > { %1919 = vmatmul.msk.bf16.gmra.mxu2 %vm737_vm3, %v1086_v60 }
 0x265   : > { %v943_v63 = vpop.f32.mrf.mxu1  ;;  %v1283_v0 = vpop.f32.mrf.mxu2 }
 0x266   : > { %1411 = vst.msk [vmem:[%s2373_s15 + $0xb0] sm:$0xff] %vm1388_vm4, %v1283_v0  ;;  %v1043_v5 = vmax.f32 %v943_v63, 0.0 }
 0x268   : > { %1880 = vmatmul.msk.bf16.gmra.mxu3 %vm737_vm3, %v709_v1 }
 0x26d   : > { %v945_v3 = vpop.f32.mrf.mxu1  ;;  %v1285_v4 = vpop.f32.mrf.mxu2 }
 0x26e   : > { %v1044_v6 = vmax.f32 %v945_v3, 0.0  ;;  %1412 = vst.msk [vmem:[%s2373_s15 + $0xb8] sm:$0xff] %vm1388_vm4, %v1285_v4 }
 0x270   : > { %v1087_v7 = vpack.c.bf16 %v1044_v6, %v1043_v5 }
 0x272   : > { %1920 = vmatmul.msk.bf16.gmra.mxu2 %vm737_vm3, %v1087_v7 }
 0x275   : > { %v948_v24 = vpop.f32.mrf.mxu1  ;;  %v1288_v11 = vpop.f32.mrf.mxu2 }
 0x276   : > { %1413 = vst.msk [vmem:[%s2373_s15 + $0xc0] sm:$0xff] %vm1388_vm4, %v1288_v11  ;;  %v1045_v32 = vmax.f32 %v948_v24, 0.0 }
 0x278   : > { %1881 = vmatmul.msk.bf16.gmra.mxu3 %vm737_vm3, %v710_v12 }
 0x27d   : > { %v950_v28 = vpop.f32.mrf.mxu1  ;;  %v1290_v14 = vpop.f32.mrf.mxu2 }
 0x27e   : > { %v1046_v15 = vmax.f32 %v950_v28, 0.0  ;;  %1414 = vst.msk [vmem:[%s2373_s15 + $0xc8] sm:$0xff] %vm1388_vm4, %v1290_v14 }
 0x280   : > { %v1088_v16 = vpack.c.bf16 %v1046_v15, %v1045_v32 }
 0x282   : > { %1921 = vmatmul.msk.bf16.gmra.mxu2 %vm737_vm3, %v1088_v16 }
 0x285   : > { %v953_v20 = vpop.f32.mrf.mxu1  ;;  %v1293_v35 = vpop.f32.mrf.mxu2 }
 0x286   : > { %1415 = vst.msk [vmem:[%s2373_s15 + $0xd0] sm:$0xff] %vm1388_vm4, %v1293_v35  ;;  %v1047_v25 = vmax.f32 %v953_v20, 0.0 }
 0x288   : > { %1882 = vmatmul.msk.bf16.gmra.mxu3 %vm737_vm3, %v711_v21 }
 0x28d   : > { %v955_v22 = vpop.f32.mrf.mxu1  ;;  %v1295_v23 = vpop.f32.mrf.mxu2 }
 0x28e   : > { %v1048_v26 = vmax.f32 %v955_v22, 0.0  ;;  %1416 = vst.msk [vmem:[%s2373_s15 + $0xd8] sm:$0xff] %vm1388_vm4, %v1295_v23 }
 0x290   : > { %v1089_v29 = vpack.c.bf16 %v1048_v26, %v1047_v25 }
 0x292   : > { %1922 = vmatmul.msk.bf16.gmra.mxu2 %vm737_vm3, %v1089_v29 }
 0x295   : > { %v958_v33 = vpop.f32.mrf.mxu1  ;;  %v1298_v34 = vpop.f32.mrf.mxu2 }
 0x296   : > { %1417 = vst.msk [vmem:[%s2373_s15 + $0xe0] sm:$0xff] %vm1388_vm4, %v1298_v34  ;;  %v1049_v39 = vmax.f32 %v958_v33, 0.0 }
 0x298   : > { %1883 = vmatmul.msk.bf16.gmra.mxu3 %vm737_vm3, %v712_v36 }
 0x29d   : > { %v960_v37 = vpop.f32.mrf.mxu1  ;;  %v1300_v38 = vpop.f32.mrf.mxu2 }
 0x29e   : > { %v1050_v40 = vmax.f32 %v960_v37, 0.0  ;;  %1418 = vst.msk [vmem:[%s2373_s15 + $0xe8] sm:$0xff] %vm1388_vm4, %v1300_v38 }
 0x2a0   : > { %v1090_v41 = vpack.c.bf16 %v1050_v40, %v1049_v39 }
 0x2a2   : > { %1923 = vmatmul.msk.bf16.gmra.mxu2 %vm737_vm3, %v1090_v41 }
 0x2a5   : > { %v1303_v42 = vpop.f32.mrf.mxu2 }
 0x2a6   : > { %1419 = vst.msk [vmem:[%s2373_s15 + $0xf0] sm:$0xff] %vm1388_vm4, %v1303_v42 }
 0x2ab   : > { %v963_v43 = vpop.f32.mrf.mxu3 }
 0x2ac   : > { %v1051_v46 = vmax.f32 %v963_v43, 0.0 }
 0x2ad   : > { %v1305_v44 = vpop.f32.mrf.mxu2 }
 0x2ae   : > { %1420 = vst.msk [vmem:[%s2373_s15 + $0xf8] sm:$0xff] %vm1388_vm4, %v1305_v44 }
 0x2b3   : > { %v965_v45 = vpop.f32.mrf.mxu3 }
 0x2b4   : > { %v1052_v47 = vmax.f32 %v965_v45, 0.0 }
 0x2b5   : > { %v1308_v48 = vpop.f32.mrf.mxu2 }
 0x2b6   : > { %v1091_v49 = vpack.c.bf16 %v1052_v47, %v1051_v46  ;;  %1421 = vst.msk [vmem:[%s2373_s15 + $0x100] sm:$0xff] %vm1388_vm4, %v1308_v48 }
 0x2b8   : > { %1924 = vmatmul.msk.bf16.vlgmr.msra.gmra.mxu3 %vm737_vm3, %v1091_v49 }
 0x2bb   : > { %v968_v50 = vpop.f32.mrf.mxu3 }
 0x2bc   : > { %v1053_v53 = vmax.f32 %v968_v50, 0.0 }
 0x2bd   : > { %v1310_v51 = vpop.f32.mrf.mxu2 }
 0x2be   : > { %1422 = vst.msk [vmem:[%s2373_s15 + $0x108] sm:$0xff] %vm1388_vm4, %v1310_v51 }
 0x2c3   : > { %v970_v52 = vpop.f32.mrf.mxu3 }
 0x2c4   : > { %v1054_v54 = vmax.f32 %v970_v52, 0.0 }
 0x2c5   : > { %v1313_v55 = vpop.f32.mrf.mxu2 }
 0x2c6   : > { %v1092_v56 = vpack.c.bf16 %v1054_v54, %v1053_v53  ;;  %1423 = vst.msk [vmem:[%s2373_s15 + $0x110] sm:$0xff] %vm1388_vm4, %v1313_v55 }
 0x2c8   : > { %1925 = vmatmul.msk.bf16.gmra.mxu3 %vm737_vm3, %v1092_v56 }
 0x2cb   : > { %v973_v57 = vpop.f32.mrf.mxu3 }
 0x2cc   : > { %v1055_v60 = vmax.f32 %v973_v57, 0.0 }
 0x2cd   : > { %v1315_v58 = vpop.f32.mrf.mxu2 }
 0x2ce   : > { %1424 = vst.msk [vmem:[%s2373_s15 + $0x118] sm:$0xff] %vm1388_vm4, %v1315_v58 }
 0x2d3   : > { %v975_v59 = vpop.f32.mrf.mxu3 }
 0x2d4   : > { %v1056_v61 = vmax.f32 %v975_v59, 0.0 }
 0x2d5   : > { %v1318_v62 = vpop.f32.mrf.mxu2 }
 0x2d6   : > { %v1093_v63 = vpack.c.bf16 %v1056_v61, %v1055_v60  ;;  %1425 = vst.msk [vmem:[%s2373_s15 + $0x120] sm:$0xff] %vm1388_vm4, %v1318_v62 }
 0x2d8   : > { %1926 = vmatmul.msk.bf16.gmra.mxu3 %vm737_vm3, %v1093_v63 }
 0x2db   : > { %v978_v0 = vpop.f32.mrf.mxu3 }
 0x2dc   : > { %v1057_v3 = vmax.f32 %v978_v0, 0.0 }
 0x2dd   : > { %v1320_v1 = vpop.f32.mrf.mxu2 }
 0x2de   : > { %1426 = vst.msk [vmem:[%s2373_s15 + $0x128] sm:$0xff] %vm1388_vm4, %v1320_v1 }
 0x2e3   : > { %v980_v2 = vpop.f32.mrf.mxu3 }
 0x2e4   : > { %v1058_v4 = vmax.f32 %v980_v2, 0.0 }
 0x2e5   : > { %v1323_v5 = vpop.f32.mrf.mxu2 }
 0x2e6   : > { %v1094_v6 = vpack.c.bf16 %v1058_v4, %v1057_v3  ;;  %1427 = vst.msk [vmem:[%s2373_s15 + $0x130] sm:$0xff] %vm1388_vm4, %v1323_v5 }
 0x2e8   : > { %1927 = vmatmul.msk.bf16.gmra.mxu3 %vm737_vm3, %v1094_v6 }
 0x2eb   : > { %v983_v7 = vpop.f32.mrf.mxu3 }
 0x2ec   : > { %v1059_v10 = vmax.f32 %v983_v7, 0.0 }
 0x2ed   : > { %v1325_v8 = vpop.f32.mrf.mxu2 }
 0x2ee   : > { %1428 = vst.msk [vmem:[%s2373_s15 + $0x138] sm:$0xff] %vm1388_vm4, %v1325_v8 }
 0x2f3   : > { %v985_v9 = vpop.f32.mrf.mxu3 }
 0x2f4   : > { %v1060_v24 = vmax.f32 %v985_v9, 0.0 }
 0x2f5   : > { %v1328_v11 = vpop.f32.mrf.mxu2 }
 0x2f6   : > { %v1095_v12 = vpack.c.bf16 %v1060_v24, %v1059_v10  ;;  %1429 = vst.msk [vmem:[%s2373_s15 + $0x140] sm:$0xff] %vm1388_vm4, %v1328_v11 }
 0x2f8   : > { %1928 = vmatmul.msk.bf16.gmra.mxu3 %vm737_vm3, %v1095_v12 }
 0x2fb   : > { %v988_v13 = vpop.f32.mrf.mxu3 }
 0x2fc   : > { %v1061_v32 = vmax.f32 %v988_v13, 0.0 }
 0x2fd   : > { %v1330_v28 = vpop.f32.mrf.mxu2 }
 0x2fe   : > { %1430 = vst.msk [vmem:[%s2373_s15 + $0x148] sm:$0xff] %vm1388_vm4, %v1330_v28 }
 0x303   : > { %v990_v14 = vpop.f32.mrf.mxu3 }
 0x304   : > { %v1062_v15 = vmax.f32 %v990_v14, 0.0 }
 0x305   : > { %v1333_v16 = vpop.f32.mrf.mxu2 }
 0x306   : > { %v1096_v17 = vpack.c.bf16 %v1062_v15, %v1061_v32  ;;  %1431 = vst.msk [vmem:[%s2373_s15 + $0x150] sm:$0xff] %vm1388_vm4, %v1333_v16 }
 0x308   : > { %1929 = vmatmul.msk.bf16.gmra.mxu3 %vm737_vm3, %v1096_v17 }
 0x30b   : > { %v993_v18 = vpop.f32.mrf.mxu3 }
 0x30c   : > { %v1063_v35 = vmax.f32 %v993_v18, 0.0 }
 0x30d   : > { %v1335_v19 = vpop.f32.mrf.mxu2 }
 0x30e   : > { %1432 = vst.msk [vmem:[%s2373_s15 + $0x158] sm:$0xff] %vm1388_vm4, %v1335_v19 }
 0x313   : > { %v995_v20 = vpop.f32.mrf.mxu3 }
 0x314   : > { %v1064_v21 = vmax.f32 %v995_v20, 0.0 }
 0x315   : > { %v1338_v22 = vpop.f32.mrf.mxu2 }
 0x316   : > { %v1097_v23 = vpack.c.bf16 %v1064_v21, %v1063_v35  ;;  %1433 = vst.msk [vmem:[%s2373_s15 + $0x160] sm:$0xff] %vm1388_vm4, %v1338_v22 }
 0x318   : > { %1930 = vmatmul.msk.bf16.gmra.mxu3 %vm737_vm3, %v1097_v23 }
 0x31b   : > { %v998_v25 = vpop.f32.mrf.mxu3 }
 0x31c   : > { %v1065_v29 = vmax.f32 %v998_v25, 0.0 }
 0x31d   : > { %v1340_v26 = vpop.f32.mrf.mxu2 }
 0x31e   : > { %1434 = vst.msk [vmem:[%s2373_s15 + $0x168] sm:$0xff] %vm1388_vm4, %v1340_v26 }
 0x323   : > { %v1000_v27 = vpop.f32.mrf.mxu3 }
 0x324   : > { %v1066_v30 = vmax.f32 %v1000_v27, 0.0 }
 0x325   : > { %v1343_v31 = vpop.f32.mrf.mxu2 }
 0x326   : > { %v1098_v33 = vpack.c.bf16 %v1066_v30, %v1065_v29  ;;  %1435 = vst.msk [vmem:[%s2373_s15 + $0x170] sm:$0xff] %vm1388_vm4, %v1343_v31 }
 0x328   : > { %1931 = vmatmul.msk.bf16.gmra.mxu3 %vm737_vm3, %v1098_v33 }
 0x32d   : > { %v1345_v34 = vpop.f32.mrf.mxu2 }
 0x32e   : > { %1436 = vst.msk [vmem:[%s2373_s15 + $0x178] sm:$0xff] %vm1388_vm4, %v1345_v34 }
 0x33b   : > { %v1348_v36 = vpop.f32.mrf.mxu3 }
 0x33c   : > { %1437 = vst.msk [vmem:[%s2373_s15 + $0x180] sm:$0xff] %vm1388_vm4, %v1348_v36 }
 0x343   : > { %v1350_v37 = vpop.f32.mrf.mxu3 }
 0x344   : > { %1438 = vst.msk [vmem:[%s2373_s15 + $0x188] sm:$0xff] %vm1388_vm4, %v1350_v37 }
 0x34b   : > { %v1353_v38 = vpop.f32.mrf.mxu3 }
 0x34c   : > { %1439 = vst.msk [vmem:[%s2373_s15 + $0x190] sm:$0xff] %vm1388_vm4, %v1353_v38 }
 0x353   : > { %v1355_v39 = vpop.f32.mrf.mxu3 }
 0x354   : > { %1440 = vst.msk [vmem:[%s2373_s15 + $0x198] sm:$0xff] %vm1388_vm4, %v1355_v39 }
 0x35b   : > { %v1358_v40 = vpop.f32.mrf.mxu3 }
 0x35c   : > { %1441 = vst.msk [vmem:[%s2373_s15 + $0x1a0] sm:$0xff] %vm1388_vm4, %v1358_v40 }
 0x363   : > { %v1360_v41 = vpop.f32.mrf.mxu3 }
 0x364   : > { %1442 = vst.msk [vmem:[%s2373_s15 + $0x1a8] sm:$0xff] %vm1388_vm4, %v1360_v41 }
 0x36b   : > { %v1363_v42 = vpop.f32.mrf.mxu3 }
 0x36c   : > { %1443 = vst.msk [vmem:[%s2373_s15 + $0x1b0] sm:$0xff] %vm1388_vm4, %v1363_v42 }
 0x373   : > { %v1365_v43 = vpop.f32.mrf.mxu3 }
 0x374   : > { %1444 = vst.msk [vmem:[%s2373_s15 + $0x1b8] sm:$0xff] %vm1388_vm4, %v1365_v43 }
 0x37b   : > { %v1368_v44 = vpop.f32.mrf.mxu3 }
 0x37c   : > { %1445 = vst.msk [vmem:[%s2373_s15 + $0x1c0] sm:$0xff] %vm1388_vm4, %v1368_v44 }
 0x383   : > { %v1370_v45 = vpop.f32.mrf.mxu3 }
 0x384   : > { %1446 = vst.msk [vmem:[%s2373_s15 + $0x1c8] sm:$0xff] %vm1388_vm4, %v1370_v45 }
 0x38b   : > { %v1373_v46 = vpop.f32.mrf.mxu3 }
 0x38c   : > { %1447 = vst.msk [vmem:[%s2373_s15 + $0x1d0] sm:$0xff] %vm1388_vm4, %v1373_v46 }
 0x393   : > { %v1375_v47 = vpop.f32.mrf.mxu3 }
 0x394   : > { %1448 = vst.msk [vmem:[%s2373_s15 + $0x1d8] sm:$0xff] %vm1388_vm4, %v1375_v47 }
 0x39b   : > { %v1378_v48 = vpop.f32.mrf.mxu3 }
 0x39c   : > { %1449 = vst.msk [vmem:[%s2373_s15 + $0x1e0] sm:$0xff] %vm1388_vm4, %v1378_v48 }
 0x3a3   : > { %v1380_v49 = vpop.f32.mrf.mxu3 }
 0x3a4   : > { %1450 = vst.msk [vmem:[%s2373_s15 + $0x1e8] sm:$0xff] %vm1388_vm4, %v1380_v49 }
 0x3ab   : > { %v1383_v50 = vpop.f32.mrf.mxu3 }
 0x3ac   : > { %1451 = vst.msk [vmem:[%s2373_s15 + $0x1f0] sm:$0xff] %vm1388_vm4, %v1383_v50 }
 0x3b0   : > { %1459 = sbr.rel (!%p2199_p4) target bundleno = 1013 (0x3f5), region = 40 }
 0x3b3   : > { %v1385_v51 = vpop.f32.mrf.mxu3 }
 0x3b4   : > { %1452 = vst.msk [vmem:[%s2373_s15 + $0x1f8] sm:$0xff] %vm1388_vm4, %v1385_v51 }
 0x3b5   : > { %s2707_s7 = smov (!%p1462_p8, %s1461_s7), 64 }
 0x3b6   : > { %s1934_s12 = sshll.u32 %s2707_s7, 3 }
 0x3b7   : > { %p1937_p9 = scmp.eq.s32.totalorder %s1934_s12, 0 }
 0x3b8   : > { %s2563_s13 = sshrl.u32 (!%p1937_p9), %s2707_s7, 5 }
 0x3b9   : > { %1470 = sbr.rel (%p1937_p9) target bundleno = 1013 (0x3f5), region = 44  ;;  %p1938_p10 = scmp.le.s32.totalorder (!%p1937_p9), %s2563_s13, 0 }
 0x3be   : > { %1749 = sbr.rel (%p1938_p10) target bundleno = 996 (0x3e4), region = 120  ;;  %s2698_s18 = smov (!%p1938_p10), %s2557_s11 }
 0x3bf   : > { %s2699_s23 = smov (!%p1938_p10), %s2373_s15  ;;  %s2572_s26 = smov (!%p1938_p10), 0  }
 0x3c0   : > { %s2574_s14 = smov (!%p1938_p10), 0  }
 0x3c3 LB: >> { %v1595_v52 = vld [vmem:[%s2122_s23] sm:$0xff]  ;;  %v1597_v53 = vld [vmem:[%s2122_s23 + $0x8] sm:$0xff]  ;;  %v1599_v54 = vld [vmem:[%s2122_s23 + $0x10] sm:$0xff]  ;;  %s1659_s17 = sadd.s32 1, %s2126_s26  ;;  %s1589_s14 = sadd.s32 1, %s2130_s14   ;;  %s2130_s14 = sphi %s2574_s14, %s1589_s14   ;;  %s2126_s26 = sphi %s2572_s26, %s2702_s26   ;;  %s2122_s23 = sphi %s2699_s23, %s2701_s23   ;;  %s2118_s18 = sphi %s2698_s18, %s2700_s18  }
 0x3c4   : >> { %1596 = vst [vmem:[%s2118_s18] sm:$0xff] %v1595_v52  ;;  %v1601_v55 = vld [vmem:[%s2122_s23 + $0x18] sm:$0xff]  ;;  %p1660_p11 = scmp.ge.s32.totalorder %s1659_s17, %s2563_s13  ;;  %v1603_v56 = vld [vmem:[%s2122_s23 + $0x20] sm:$0xff]  ;;  %v1605_v57 = vld [vmem:[%s2122_s23 + $0x28] sm:$0xff]  ;;  %p1588_p12 = scmp.ge.s32.totalorder %s1589_s14, %s2563_s13 }
 0x3c5   : >> { %1598 = vst [vmem:[%s2118_s18 + $0x8] sm:$0xff] %v1597_v53  ;;  %v1607_v58 = vld [vmem:[%s2122_s23 + $0x30] sm:$0xff]  ;;  %v1609_v59 = vld [vmem:[%s2122_s23 + $0x38] sm:$0xff]  ;;  %v1611_v60 = vld [vmem:[%s2122_s23 + $0x40] sm:$0xff] }
 0x3c6   : >> { %1600 = vst [vmem:[%s2118_s18 + $0x10] sm:$0xff] %v1599_v54  ;;  %s2709_s17 = smov (%p1660_p11, %s1659_s17), 0  ;;  %v1613_v61 = vld [vmem:[%s2122_s23 + $0x48] sm:$0xff]  ;;  %v1615_v62 = vld [vmem:[%s2122_s23 + $0x50] sm:$0xff]  ;;  %v1617_v63 = vld [vmem:[%s2122_s23 + $0x58] sm:$0xff] }
 0x3c7   : >> { %1602 = vst [vmem:[%s2118_s18 + $0x18] sm:$0xff] %v1601_v55  ;;  %s1939_s20 = sshll.u32 %s2709_s17, 8  ;;  %v1619_v0 = vld [vmem:[%s2122_s23 + $0x60] sm:$0xff]  ;;  %v1621_v1 = vld [vmem:[%s2122_s23 + $0x68] sm:$0xff]  ;;  %v1623_v2 = vld [vmem:[%s2122_s23 + $0x70] sm:$0xff]  ;;  %s2702_s26 = smov %s2709_s17 }
 0x3c8   : >> { %1604 = vst [vmem:[%s2118_s18 + $0x20] sm:$0xff] %v1603_v56  ;;  %s2606_s21 = scalar_lea.vmem %s2373_s15, %s1939_s20 [#allocation2]   ;;  %s2609_s24 = scalar_lea.vmem %s2557_s11, %s1939_s20   ;;  %v1625_v3 = vld [vmem:[%s2122_s23 + $0x78] sm:$0xff]  ;;  %v1627_v4 = vld [vmem:[%s2122_s23 + $0x80] sm:$0xff]  ;;  %v1629_v5 = vld [vmem:[%s2122_s23 + $0x88] sm:$0xff] }
 0x3c9   : >> { %1606 = vst [vmem:[%s2118_s18 + $0x28] sm:$0xff] %v1605_v57  ;;  %v1631_v6 = vld [vmem:[%s2122_s23 + $0x90] sm:$0xff]  ;;  %v1633_v7 = vld [vmem:[%s2122_s23 + $0x98] sm:$0xff]  ;;  %v1635_v8 = vld [vmem:[%s2122_s23 + $0xa0] sm:$0xff] }
 0x3ca   : >> { %1608 = vst [vmem:[%s2118_s18 + $0x30] sm:$0xff] %v1607_v58  ;;  %v1637_v9 = vld [vmem:[%s2122_s23 + $0xa8] sm:$0xff]  ;;  %v1639_v10 = vld [vmem:[%s2122_s23 + $0xb0] sm:$0xff]  ;;  %v1641_v24 = vld [vmem:[%s2122_s23 + $0xb8] sm:$0xff] }
 0x3cb   : >> { %1610 = vst [vmem:[%s2118_s18 + $0x38] sm:$0xff] %v1609_v59  ;;  %v1643_v11 = vld [vmem:[%s2122_s23 + $0xc0] sm:$0xff]  ;;  %v1645_v12 = vld [vmem:[%s2122_s23 + $0xc8] sm:$0xff]  ;;  %v1647_v13 = vld [vmem:[%s2122_s23 + $0xd0] sm:$0xff] }
 0x3cc   : >> { %1612 = vst [vmem:[%s2118_s18 + $0x40] sm:$0xff] %v1611_v60  ;;  %v1649_v28 = vld [vmem:[%s2122_s23 + $0xd8] sm:$0xff]  ;;  %v1651_v14 = vld [vmem:[%s2122_s23 + $0xe0] sm:$0xff]  ;;  %v1653_v32 = vld [vmem:[%s2122_s23 + $0xe8] sm:$0xff] }
 0x3cd   : >> { %1614 = vst [vmem:[%s2118_s18 + $0x48] sm:$0xff] %v1613_v61  ;;  %v1655_v15 = vld [vmem:[%s2122_s23 + $0xf0] sm:$0xff]  ;;  %v1657_v16 = vld [vmem:[%s2122_s23 + $0xf8] sm:$0xff]  ;;  %s2701_s23 = smov %s2606_s21 }
 0x3ce   : >> { %1616 = vst [vmem:[%s2118_s18 + $0x50] sm:$0xff] %v1615_v62 }
 0x3cf   : >> { %1618 = vst [vmem:[%s2118_s18 + $0x58] sm:$0xff] %v1617_v63 }
 0x3d0   : >> { %1620 = vst [vmem:[%s2118_s18 + $0x60] sm:$0xff] %v1619_v0 }
 0x3d1   : >> { %1622 = vst [vmem:[%s2118_s18 + $0x68] sm:$0xff] %v1621_v1 }
 0x3d2   : >> { %1624 = vst [vmem:[%s2118_s18 + $0x70] sm:$0xff] %v1623_v2 }
 0x3d3   : >> { %1626 = vst [vmem:[%s2118_s18 + $0x78] sm:$0xff] %v1625_v3 }
 0x3d4   : >> { %1628 = vst [vmem:[%s2118_s18 + $0x80] sm:$0xff] %v1627_v4 }
 0x3d5   : >> { %1630 = vst [vmem:[%s2118_s18 + $0x88] sm:$0xff] %v1629_v5 }
 0x3d6   : >> { %1632 = vst [vmem:[%s2118_s18 + $0x90] sm:$0xff] %v1631_v6 }
 0x3d7   : >> { %1634 = vst [vmem:[%s2118_s18 + $0x98] sm:$0xff] %v1633_v7 }
 0x3d8   : >> { %1636 = vst [vmem:[%s2118_s18 + $0xa0] sm:$0xff] %v1635_v8 }
 0x3d9   : >> { %1638 = vst [vmem:[%s2118_s18 + $0xa8] sm:$0xff] %v1637_v9 }
 0x3da   : >> { %1640 = vst [vmem:[%s2118_s18 + $0xb0] sm:$0xff] %v1639_v10 }
 0x3db   : >> { %1642 = vst [vmem:[%s2118_s18 + $0xb8] sm:$0xff] %v1641_v24 }
 0x3dc   : >> { %1644 = vst [vmem:[%s2118_s18 + $0xc0] sm:$0xff] %v1643_v11 }
 0x3dd   : >> { %1646 = vst [vmem:[%s2118_s18 + $0xc8] sm:$0xff] %v1645_v12 }
 0x3de   : >> { %1648 = vst [vmem:[%s2118_s18 + $0xd0] sm:$0xff] %v1647_v13 }
 0x3df   : >> { %1650 = vst [vmem:[%s2118_s18 + $0xd8] sm:$0xff] %v1649_v28  ;;  %1591 = sbr.rel (!%p1588_p12) target bundleno = 963 (0x3c3), region = 126 }
 0x3e0   : >> { %1652 = vst [vmem:[%s2118_s18 + $0xe0] sm:$0xff] %v1651_v14 }
 0x3e1   : >> { %1654 = vst [vmem:[%s2118_s18 + $0xe8] sm:$0xff] %v1653_v32 }
 0x3e2   : >> { %1656 = vst [vmem:[%s2118_s18 + $0xf0] sm:$0xff] %v1655_v15 }
 0x3e3   : >> { %1658 = vst [vmem:[%s2118_s18 + $0xf8] sm:$0xff] %v1657_v16  ;;  %s2700_s18 = smov %s2609_s24 }
 0x3e4 PF: > { %s2674_s25 = sand.u32 31, %s2707_s7   ;;  %s1959_s27 = sshll.u32 %s2563_s13, 8 }
 0x3e5   : > { %s1670_s28 = scalar_lea.vmem %s2373_s15, %s1959_s27 [#allocation2]   ;;  %s1672_s29 = scalar_lea.vmem %s2557_s11, %s1959_s27  }
 0x3e6   : > { %p1944_p13 = scmp.le.s32.totalorder %s2674_s25, 0 }
 0x3e7   : > { %s2132_s30 = smov (!%p1944_p13), %s1672_s29   ;;  %s2136_s5 = smov (!%p1944_p13), %s1670_s28  }
 0x3e8   : > { %1763 = sbr.rel (%p1944_p13) target bundleno = 1013 (0x3f5), region = 131  ;;  %s2140_s6 = smov (!%p1944_p13), 0  }
 0x3e9   : > { %s2144_s8 = smov (!%p1944_p13), 0  }
 0x3ed LB: >> { %v1682_v17 = vld [vmem:[%s2138_s5] sm:$0xff]  ;;  %s1684_s7 = sadd.s32 1, %s2142_s6  ;;  %s1676_s8 = sadd.s32 1, %s2146_s8   ;;  %s2146_s8 = sphi %s2144_s8, %s1676_s8   ;;  %s2142_s6 = sphi %s2140_s6, %s2141_s6   ;;  %s2138_s5 = sphi %s2136_s5, %s1689_s5   ;;  %s2134_s30 = sphi %s2132_s30, %s1690_s30  }
 0x3ee   : >> { %1683 = vst [vmem:[%s2134_s30] sm:$0xff] %v1682_v17  ;;  %p1685_p0 = scmp.ge.s32.totalorder %s1684_s7, %s2674_s25  ;;  %p1675_p1 = scmp.ge.s32.totalorder %s1676_s8, %s2674_s25 }
 0x3f0   : >> { %s2711_s7 = smov (%p1685_p0, %s1684_s7), 0  ;;  %1678 = sbr.rel (!%p1675_p1) target bundleno = 1005 (0x3ed), region = 137 }
 0x3f1   : >> { %s1945_s15 = sshll.u32 %s2711_s7, 3  ;;  %s2141_s6 = smov %s2711_s7  }
 0x3f2   : >> { %s1689_s5 = scalar_lea.vmem %s1670_s28, %s1945_s15 [#allocation2]   ;;  %s1690_s30 = scalar_lea.vmem %s1672_s29, %s1945_s15  }
 0x3f5 PF: > { %p11_p2 = scmp.ge.s32.totalorder %s2189_s19, 4   ;;  %s2703_s15 = smov %s2110_s16 }
 0x3f6   : > { %s2704_s16 = smov %s2197_s22  ;;  %s2705_s17 = smov %s2189_s19 }
 0x3f7   :  { %13 = sbr.rel (!%p11_p2) target bundleno = 2 (0x2), region = 148 }

</bundles_post_ra>
